<compile_context>
chip_gen: v7x
topology: tpu7x:2x2x1
jax: 0.10.0
libtpu: 0.0.40
codegen_flags: <defaults>
</compile_context>

<pallas_src>
import math

import jax
import jax.numpy as jnp
from jax.experimental import pallas as pl
from jax.experimental.pallas import tpu as pltpu

EPSILON = 1e-07
MU0 = (64.0, 20.0, -10.0)
SIGMA0 = (12.0, 7.0, 5.0)

_XYZ_REF = (0.95047, 1.0, 1.08883)           # D65 white point (kornia)

# rgb->xyz rows with the white-point division folded in (X/0.95047, Y/1, Z/1.08883)
_RGB2FX = (0.412453 / _XYZ_REF[0], 0.357580 / _XYZ_REF[0], 0.180423 / _XYZ_REF[0])
_RGB2FY = (0.212671, 0.715160, 0.072169)
_RGB2FZ = (0.019334 / _XYZ_REF[2], 0.119193 / _XYZ_REF[2], 0.950227 / _XYZ_REF[2])

# xyz->rgb columns with the white-point multiplication folded in
_X2R, _Y2R, _Z2R = (3.2404813432005266 * _XYZ_REF[0], -1.5371515162713185,
                    -0.4985363261688878 * _XYZ_REF[2])
_X2G, _Y2G, _Z2G = (-0.9692549499965682 * _XYZ_REF[0], 1.8759900014898907,
                    0.0415559265582928 * _XYZ_REF[2])
_X2B, _Y2B, _Z2B = (0.0556466391351772 * _XYZ_REF[0], -0.2040413383665112,
                    1.0573110696453443 * _XYZ_REF[2])

_LAB_EPS = 0.008856            # (6/29)**3 threshold (kornia)
_LAB_KAPPA = 7.787
_LAB_OFF = 4.0 / 29.0

# Accumulate statistics around the expected per-channel center (MU0) so the
# one-pass sum / sum-of-squares variance stays well conditioned (L mean ~50-90).
_CENTER = MU0

_TARGET_TILE_ELEMS = 256 * 1024   # per-channel f32 elems per tile (~1 MiB / ch, ~3 MiB block)
_MAX_TILE_ELEMS = 512 * 1024      # hard cap (~6 MiB block) -> v7x (64 MiB VMEM) safe
_VMEM_LIMIT = 40 * 1024 * 1024    # scoped-VMEM budget; < 48 MiB per review, fits all gens

# Cube root: False (default) -> EUP via jnp.power (pass 1 is VALU-bound, EUP idle);
# True -> VPU-only Newton (3 iterations) kept for benchmarking.
_USE_NEWTON_CBRT = False


# ----------------------------------------------------------------------------
# element-wise color helpers (VPU/EUP work inside the kernels)
# ----------------------------------------------------------------------------
def _srgb_to_linear(c):
    # kornia rgb_to_linear_rgb; constant divisions folded to multiplies.
    return jnp.where(c > 0.04045,
                     jnp.power((c + 0.055) * (1.0 / 1.055), 2.4),
                     c * (1.0 / 12.92))


def _linear_to_srgb(c):
    # kornia linear_rgb_to_rgb (clamps to the threshold before the fractional pow).
    return jnp.where(c > 0.0031308,
                     1.055 * jnp.power(jnp.maximum(c, 0.0031308), 1.0 / 2.4) - 0.055,
                     12.92 * c)


def _cbrt_newton(t):
    """VPU-only cube root (t >= _LAB_EPS > 0): bit-pattern seed + 3 Newton steps."""
    bits = pltpu.bitcast(t, jnp.int32).astype(jnp.float32)
    seed = (4261412864.0 - bits) * (1.0 / 3.0)        # 4261412864 = 4 * 127 * 2^23
    r = pltpu.bitcast(seed.astype(jnp.int32), jnp.float32)
    for _ in range(3):                                 # seed err < 9% -> 3 iters ~1e-6 rel
        r = r * (4.0 - t * r * r * r) * (1.0 / 3.0)
    return t * r * r


def _lab_f(t):
    tc = jnp.maximum(t, _LAB_EPS)                      # kornia clamps before cbrt
    if _USE_NEWTON_CBRT:
        cbrt = _cbrt_newton(tc)
    else:
        cbrt = jnp.power(tc, 1.0 / 3.0)                # EUP (exp/log); VALU slot is the binder
    return jnp.where(t > _LAB_EPS, cbrt, _LAB_KAPPA * t + _LAB_OFF)


def _lab_f_inv(t):
    return jnp.where(t > 0.2068966, t * t * t, (t - _LAB_OFF) * (1.0 / _LAB_KAPPA))


# ----------------------------------------------------------------------------
# pass 1: rgb -> lab, fused per-(batch, channel) centered partial statistics
# ----------------------------------------------------------------------------
def _rgb_to_lab_stats_kernel(x_ref, lab_ref, stats_ref):
    """x_ref/lab_ref: (1, 3, TILE_R, L); stats_ref: (1, 1, 6, L) resident accumulator.

    stats rows 0..2 hold per-lane partial sums of centered (L, a, b), rows 3..5
    the partial sums of their squares.  The accumulator block index is constant
    along the (last, "arbitrary") tile axis, so it stays resident in VMEM.
    """
    @pl.when(pl.program_id(2) == 0)
    def _init():
        stats_ref[...] = jnp.zeros_like(stats_ref)

    r = x_ref[0, 0]                                    # (TILE_R, L) dense slabs
    g = x_ref[0, 1]
    b = x_ref[0, 2]

    rl = _srgb_to_linear(r)
    gl = _srgb_to_linear(g)
    bl = _srgb_to_linear(b)

    # 3x3 transform kept as VPU FMAs (NOT an MXU matmul); white point folded in.
    fx = _lab_f(_RGB2FX[0] * rl + _RGB2FX[1] * gl + _RGB2FX[2] * bl)
    fy = _lab_f(_RGB2FY[0] * rl + _RGB2FY[1] * gl + _RGB2FY[2] * bl)
    fz = _lab_f(_RGB2FZ[0] * rl + _RGB2FZ[1] * gl + _RGB2FZ[2] * bl)

    l_ch = 116.0 * fy - 16.0
    a_ch = 500.0 * (fx - fy)
    b_ch = 200.0 * (fy - fz)

    # per-channel direct writes (no concatenate on the image data)
    lab_ref[0, 0] = l_ch.astype(lab_ref.dtype)
    lab_ref[0, 1] = a_ch.astype(lab_ref.dtype)
    lab_ref[0, 2] = b_ch.astype(lab_ref.dtype)

    # Centered partials (sublane reduce only); six rows stacked into ONE block
    # update so there is a single (6, L) RMW per step instead of six masked
    # single-sublane stores.
    lc = l_ch - _CENTER[0]
    ac = a_ch - _CENTER[1]
    bc = b_ch - _CENTER[2]
    partial = jnp.concatenate(
        [jnp.sum(lc, axis=0, keepdims=True),
         jnp.sum(ac, axis=0, keepdims=True),
         jnp.sum(bc, axis=0, keepdims=True),
         jnp.sum(lc * lc, axis=0, keepdims=True),
         jnp.sum(ac * ac, axis=0, keepdims=True),
         jnp.sum(bc * bc, axis=0, keepdims=True)], axis=0)      # (6, L)
    stats_ref[0, 0] += partial


# ----------------------------------------------------------------------------
# pass 2: lab * scale + offset, lab -> rgb, clip
# ----------------------------------------------------------------------------
def _lab_norm_to_rgb_kernel(lab_ref, scale_ref, offset_ref, o_ref):
    """lab_ref/o_ref: (1, 3, TILE_R, L); scale/offset: (B, 3) f32 scalars in SMEM."""
    bi = pl.program_id(0)

    l_ch = lab_ref[0, 0].astype(jnp.float32) * scale_ref[bi, 0] + offset_ref[bi, 0]
    a_ch = lab_ref[0, 1].astype(jnp.float32) * scale_ref[bi, 1] + offset_ref[bi, 1]
    b_ch = lab_ref[0, 2].astype(jnp.float32) * scale_ref[bi, 2] + offset_ref[bi, 2]

    fy = (l_ch + 16.0) * (1.0 / 116.0)
    fx = a_ch * (1.0 / 500.0) + fy
    fz = jnp.maximum(fy - b_ch * (1.0 / 200.0), 0.0)   # kornia clamps fz only

    xv = _lab_f_inv(fx)
    yv = _lab_f_inv(fy)
    zv = _lab_f_inv(fz)

    rl = _X2R * xv + _Y2R * yv + _Z2R * zv             # white point folded in
    gl = _X2G * xv + _Y2G * yv + _Z2G * zv
    bl = _X2B * xv + _Y2B * yv + _Z2B * zv

    o_ref[0, 0] = jnp.clip(_linear_to_srgb(rl), 0.0, 1.0)
    o_ref[0, 1] = jnp.clip(_linear_to_srgb(gl), 0.0, 1.0)
    o_ref[0, 2] = jnp.clip(_linear_to_srgb(bl), 0.0, 1.0)


# ----------------------------------------------------------------------------
# layout: choose lane and tile_rows JOINTLY (no divisor cliff)
# ----------------------------------------------------------------------------
def _choose_layout(hw):
    """Return (lane, rows, tile_rows) for a dense (rows, lane) spatial layout.

    Candidates: lane in {1024,512,256,128} dividing hw; tile_rows is either a
    multiple-of-8 divisor of rows or rows itself (both satisfy the (8,128)
    block constraint).  Score by log-distance of tile elems to the target,
    penalizing oversized tiles, tiles above the VMEM cap, and non-sublane-
    aligned (tiny-image) fallbacks; prefer the larger lane on ties.
    """
    best = None
    for lane in (1024, 512, 256, 128):
        if hw % lane:
            continue
        rows = hw // lane
        cands = {rows}
        tr = 8
        while tr < rows:
            if rows % tr == 0:
                cands.add(tr)
            tr += 8
        for tr in cands:
            elems = tr * lane
            if elems <= _TARGET_TILE_ELEMS:
                dist = math.log2(_TARGET_TILE_ELEMS / elems)
            else:
                dist = 2.0 * math.log2(elems / _TARGET_TILE_ELEMS)
            if elems > _MAX_TILE_ELEMS:
                dist += 16.0                       # last-resort only
            if tr % 8 != 0:
                dist += 4.0                        # partial-sublane strips are slow
            score = (dist, -lane)
            if best is None or score < best[:2]:
                best = (score[0], score[1], lane, rows, tr)
    if best is None:
        raise ValueError("H*W must be a multiple of 128 for a lane-aligned layout")
    return best[2], best[3], best[4]


# ----------------------------------------------------------------------------
# wrapper
# ----------------------------------------------------------------------------
def lab_prenorm(x, mu_param, sigma_param, mu0=MU0, sigma0=SIGMA0, epsilon=EPSILON,
                lab_dtype=jnp.float32):
    """x: (B, 3, H, W) float32 in [0, 1].  Returns (model(x_norm), x_norm), model=Identity.

    lab_dtype=jnp.bfloat16 halves the lab HBM round-trip (recommended on the
    memory-bound v5e); statistics are always accumulated in f32.
    """
    B, C, H, W = x.shape
    assert C == 3, "LabPreNorm expects RGB input"
    hw = H * W
    lane, rows, tile_rows = _choose_layout(hw)
    n_tiles = rows // tile_rows

    # v7x: make sure pass 1 has >= 2 parallel work units (batch x group) so both
    # TensorCores get work even at B == 1.  The tile axis itself must stay
    # "arbitrary" (stats reduction), so parallelism comes from a group split.
    if B == 1 and n_tiles % 2 != 0 and tile_rows % 16 == 0:
        tile_rows //= 2
        n_tiles *= 2
    n_groups = 2 if (n_tiles % 2 == 0 and n_tiles >= 2) else 1
    tiles_per_group = n_tiles // n_groups

    x4 = x.reshape(B, 3, rows, lane).astype(jnp.float32)

    block = (1, 3, tile_rows, lane)
    npx = B * hw

    # ---- pass 1: rgb -> lab + per-(b, c) centered partial stats -------------
    lab4, stats = pl.pallas_call(
        _rgb_to_lab_stats_kernel,
        out_shape=(jax.ShapeDtypeStruct((B, 3, rows, lane), lab_dtype),
                   jax.ShapeDtypeStruct((B, n_groups, 6, lane), jnp.float32)),
        grid_spec=pltpu.PrefetchScalarGridSpec(
            num_scalar_prefetch=0,
            grid=(B, n_groups, tiles_per_group),
            in_specs=[pl.BlockSpec(block,
                                   lambda bi, gi, ti: (bi, 0, gi * tiles_per_group + ti, 0))],
            out_specs=[pl.BlockSpec(block,
                                    lambda bi, gi, ti: (bi, 0, gi * tiles_per_group + ti, 0)),
                       pl.BlockSpec((1, 1, 6, lane),
                                    lambda bi, gi, ti: (bi, gi, 0, 0))],
        ),
        compiler_params=pltpu.CompilerParams(
            dimension_semantics=("parallel", "parallel", "arbitrary"),
            vmem_limit_bytes=_VMEM_LIMIT),
        cost_estimate=pl.CostEstimate(
            flops=npx * 3 * 40,
            transcendentals=npx * 3 * 2,
            bytes_accessed=npx * 3 * (4 + jnp.dtype(lab_dtype).itemsize)),
    )(x4)

    # ---- finalize per-(batch, channel) statistics (tiny, plain JAX) ---------
    # Centered one-pass moments: mean = c + s1/n, var = (s2 - s1^2/n)/(n-1).
    centers = jnp.asarray(_CENTER, jnp.float32)                   # (3,)
    n = jnp.float32(hw)
    s1 = jnp.sum(stats[:, :, 0:3, :], axis=(1, 3))                # (B, 3)
    s2 = jnp.sum(stats[:, :, 3:6, :], axis=(1, 3))                # (B, 3)
    mean = centers[None, :] + s1 / n
    var = jnp.maximum((s2 - s1 * s1 / n) / (n - 1.0), 0.0)        # unbiased (ddof=1)
    std = jnp.sqrt(var)

    mu_prime = jnp.asarray(mu_param, jnp.float32) + jnp.asarray(mu0, jnp.float32)
    sigma_prime = jnp.asarray(sigma_param, jnp.float32) + jnp.asarray(sigma0, jnp.float32)
    scale = sigma_prime[None, :] / (std + jnp.float32(epsilon))   # (B, 3)
    offset = mu_prime[None, :] - mean * scale                     # (B, 3)

    # ---- pass 2: normalize in Lab + lab -> rgb -------------------------------
    # Output aliases the lab buffer (peak-HBM saving) when dtypes match.
    io_alias = {0: 0} if jnp.dtype(lab_dtype) == jnp.dtype(jnp.float32) else {}

    out4 = pl.pallas_call(
        _lab_norm_to_rgb_kernel,
        out_shape=jax.ShapeDtypeStruct((B, 3, rows, lane), jnp.float32),
        grid_spec=pltpu.PrefetchScalarGridSpec(
            num_scalar_prefetch=0,
            grid=(B, n_tiles),
            in_specs=[pl.BlockSpec(block, lambda bi, ti: (bi, 0, ti, 0)),
                      pl.BlockSpec(memory_space=pltpu.MemorySpace.SMEM),
                      pl.BlockSpec(memory_space=pltpu.MemorySpace.SMEM)],
            out_specs=pl.BlockSpec(block, lambda bi, ti: (bi, 0, ti, 0)),
        ),
        compiler_params=pltpu.CompilerParams(
            dimension_semantics=("parallel", "parallel"),
            vmem_limit_bytes=_VMEM_LIMIT),
        input_output_aliases=io_alias,
        cost_estimate=pl.CostEstimate(
            flops=npx * 3 * 30,
            transcendentals=npx * 3 * 2,
            bytes_accessed=npx * 3 * (4 + jnp.dtype(lab_dtype).itemsize)),
    )(lab4, scale, offset)

    x_norm = out4.reshape(B, 3, H, W)
    # self.model defaults to nn.Identity()
    return x_norm, x_norm


# ----------------------------------------------------------------------------
# pure-JAX reference (mirrors the PyTorch / kornia math) for a sanity check
# ----------------------------------------------------------------------------
def _reference_lab_prenorm(x, mu_param, sigma_param, mu0=MU0, sigma0=SIGMA0,
                           epsilon=EPSILON):
    x = x.astype(jnp.float32)
    r, g, b = x[:, 0], x[:, 1], x[:, 2]

    def s2l(c):
        return jnp.where(c > 0.04045, jnp.power((c + 0.055) / 1.055, 2.4), c / 12.92)

    rl, gl, bl = s2l(r), s2l(g), s2l(b)
    X = 0.412453 * rl + 0.357580 * gl + 0.180423 * bl
    Y = 0.212671 * rl + 0.715160 * gl + 0.072169 * bl
    Z = 0.019334 * rl + 0.119193 * gl + 0.950227 * bl

    def f(t):
        return jnp.where(t > _LAB_EPS,
                         jnp.power(jnp.maximum(t, _LAB_EPS), 1.0 / 3.0),
                         _LAB_KAPPA * t + _LAB_OFF)

    fx, fy, fz = f(X / _XYZ_REF[0]), f(Y / _XYZ_REF[1]), f(Z / _XYZ_REF[2])
    lab = jnp.stack([116.0 * fy - 16.0, 500.0 * (fx - fy), 200.0 * (fy - fz)], axis=1)

    mu = lab.mean(axis=(2, 3), keepdims=True)
    sigma = lab.std(axis=(2, 3), ddof=1, keepdims=True) + epsilon
    mu_p = (jnp.asarray(mu_param, jnp.float32) + jnp.asarray(mu0, jnp.float32)).reshape(1, 3, 1, 1)
    sg_p = (jnp.asarray(sigma_param, jnp.float32) + jnp.asarray(sigma0, jnp.float32)).reshape(1, 3, 1, 1)
    lab = (lab - mu) / sigma * sg_p + mu_p

    Ln, An, Bn = lab[:, 0], lab[:, 1], lab[:, 2]
    fy2 = (Ln + 16.0) / 116.0
    fx2 = An / 500.0 + fy2
    fz2 = jnp.maximum(fy2 - Bn / 200.0, 0.0)

    def finv(t):
        return jnp.where(t > 0.2068966, t ** 3, (t - _LAB_OFF) / _LAB_KAPPA)

    X2, Y2, Z2 = finv(fx2) * _XYZ_REF[0], finv(fy2) * _XYZ_REF[1], finv(fz2) * _XYZ_REF[2]
    Rl = 3.2404813432005266 * X2 - 1.5371515162713185 * Y2 - 0.4985363261688878 * Z2
    Gl = -0.9692549499965682 * X2 + 1.8759900014898907 * Y2 + 0.0415559265582928 * Z2
    Bl = 0.0556466391351772 * X2 - 0.2040413383665112 * Y2 + 1.0573110696453443 * Z2

    def l2s(c):
        return jnp.where(c > 0.0031308,
                         1.055 * jnp.power(jnp.maximum(c, 0.0031308), 1.0 / 2.4) - 0.055,
                         12.92 * c)

    rgb = jnp.stack([l2s(Rl), l2s(Gl), l2s(Bl)], axis=1)
    return jnp.clip(rgb, 0.0, 1.0)


if __name__ == "__main__":
    key = jax.random.PRNGKey(0)

    # Parameters as initialized by LabPreNorm.__init__ (zeros).
    mu_param = jnp.zeros((3,), jnp.float32)
    sigma_param = jnp.zeros((3,), jnp.float32)

    # Input image batch in [0, 1], NCHW.
    x = jax.random.uniform(key, (2, 3, 16, 16), dtype=jnp.float32,
                           minval=0.0, maxval=1.0)

    y_model, x_norm = jax.jit(lab_prenorm)(x, mu_param, sigma_param)
    jax.block_until_ready(x_norm)
    jax.block_until_ready(y_model)

    assert x_norm.shape == x.shape and x_norm.dtype == jnp.float32
    assert bool(jnp.all(jnp.isfinite(x_norm)))

    ref = _reference_lab_prenorm(x, mu_param, sigma_param)
    max_err = float(jnp.max(jnp.abs(x_norm - ref)))
    assert max_err < 5e-3, f"mismatch vs reference: max abs err = {max_err}"

    # Second check on a sublane-aligned dense layout (exercises the tiled path).
    x2 = jax.random.uniform(jax.random.PRNGKey(1), (1, 3, 64, 64),
                            dtype=jnp.float32, minval=0.0, maxval=1.0)
    _, x_norm2 = jax.jit(lab_prenorm)(x2, mu_param, sigma_param)
    jax.block_until_ready(x_norm2)
    ref2 = _reference_lab_prenorm(x2, mu_param, sigma_param)
    max_err2 = float(jnp.max(jnp.abs(x_norm2 - ref2)))
    assert max_err2 < 5e-3, f"mismatch vs reference (64x64): max abs err = {max_err2}"

    print("KERNEL_OK")
</pallas_src>

<mosaic_0001>
module attributes {stable_mosaic.version = 11 : i64} {
  func.func @_rgb_to_lab_stats_kernel(%arg0: i32, %arg1: i32, %arg2: i32, %arg3: memref<1x3x1x256xf32, #tpu.memory_space<vmem>>, %arg4: memref<1x3x1x256xf32, #tpu.memory_space<vmem>>, %arg5: memref<1x1x6x256xf32, #tpu.memory_space<vmem>>) attributes {dimension_semantics = [#tpu.dimension_semantics<parallel>, #tpu.dimension_semantics<parallel>, #tpu.dimension_semantics<arbitrary>], iteration_bounds = array<i64: 2, 1, 1>, scalar_prefetch = 0 : i64, scratch_operands = 0 : i64, tpu.core_type = #tpu.core_type<tc>, window_params = [{transform_indices = @transform_0, window_bounds = array<i64: 1, 3, 1, 256>}, {transform_indices = @transform_1, window_bounds = array<i64: 1, 3, 1, 256>}, {transform_indices = @transform_2, window_bounds = array<i64: 1, 1, 6, 256>}]} {
    %c0_i32 = arith.constant 0 : i32
    %0 = arith.cmpi eq, %arg2, %c0_i32 : i32
    %1 = arith.extui %0 : i1 to i32
    %c0_i32_0 = arith.constant 0 : i32
    %2 = arith.cmpi ne, %1, %c0_i32_0 : i32
    scf.if %2 {
      %cst_81 = arith.constant 0.000000e+00 : f32
      %146 = vector.broadcast %cst_81 : f32 to vector<1x1x6x256xf32>
      %c0_82 = arith.constant 0 : index
      %c0_83 = arith.constant 0 : index
      %c0_84 = arith.constant 0 : index
      %c0_85 = arith.constant 0 : index
      %147 = vector.load %arg5[%c0_82, %c0_83, %c0_84, %c0_85] : memref<1x1x6x256xf32, #tpu.memory_space<vmem>>, vector<1x1x6x256xf32>
      tpu.vector_store %arg5[%c0_82, %c0_83, %c0_84, %c0_85], %146 {strides = array<i32>} : memref<1x1x6x256xf32, #tpu.memory_space<vmem>>, vector<1x1x6x256xf32>,
    } else {
    }
    %c0 = arith.constant 0 : index
    %c0_1 = arith.constant 0 : index
    %c0_2 = arith.constant 0 : index
    %c0_3 = arith.constant 0 : index
    %3 = vector.load %arg3[%c0, %c0_1, %c0_2, %c0_3] : memref<1x3x1x256xf32, #tpu.memory_space<vmem>>, vector<1x1x1x256xf32>
    %4 = vector.shape_cast %3 : vector<1x1x1x256xf32> to vector<1x256xf32>
    %c0_4 = arith.constant 0 : index
    %c1 = arith.constant 1 : index
    %c0_5 = arith.constant 0 : index
    %c0_6 = arith.constant 0 : index
    %5 = vector.load %arg3[%c0_4, %c1, %c0_5, %c0_6] : memref<1x3x1x256xf32, #tpu.memory_space<vmem>>, vector<1x1x1x256xf32>
    %6 = vector.shape_cast %5 : vector<1x1x1x256xf32> to vector<1x256xf32>
    %c0_7 = arith.constant 0 : index
    %c2 = arith.constant 2 : index
    %c0_8 = arith.constant 0 : index
    %c0_9 = arith.constant 0 : index
    %7 = vector.load %arg3[%c0_7, %c2, %c0_8, %c0_9] : memref<1x3x1x256xf32, #tpu.memory_space<vmem>>, vector<1x1x1x256xf32>
    %8 = vector.shape_cast %7 : vector<1x1x1x256xf32> to vector<1x256xf32>
    %cst = arith.constant 4.045000e-02 : f32
    %9 = vector.broadcast %cst : f32 to vector<1x256xf32>
    %10 = arith.cmpf ogt, %4, %9 : vector<1x256xf32>
    %cst_10 = arith.constant 5.500000e-02 : f32
    %11 = vector.broadcast %cst_10 : f32 to vector<1x256xf32>
    %12 = arith.addf %4, %11 : vector<1x256xf32>
    %cst_11 = arith.constant 0.947867274 : f32
    %13 = vector.broadcast %cst_11 : f32 to vector<1x256xf32>
    %14 = arith.mulf %12, %13 : vector<1x256xf32>
    %cst_12 = arith.constant 2.400000e+00 : f32
    %15 = vector.broadcast %cst_12 : f32 to vector<1x256xf32>
    %16 = math.powf %14, %15 : vector<1x256xf32>
    %cst_13 = arith.constant 0.0773993805 : f32
    %17 = vector.broadcast %cst_13 : f32 to vector<1x256xf32>
    %18 = arith.mulf %4, %17 : vector<1x256xf32>
    %19 = arith.select %10, %16, %18 : vector<1x256xi1>, vector<1x256xf32>
    %cst_14 = arith.constant 4.045000e-02 : f32
    %20 = vector.broadcast %cst_14 : f32 to vector<1x256xf32>
    %21 = arith.cmpf ogt, %6, %20 : vector<1x256xf32>
    %cst_15 = arith.constant 5.500000e-02 : f32
    %22 = vector.broadcast %cst_15 : f32 to vector<1x256xf32>
    %23 = arith.addf %6, %22 : vector<1x256xf32>
    %cst_16 = arith.constant 0.947867274 : f32
    %24 = vector.broadcast %cst_16 : f32 to vector<1x256xf32>
    %25 = arith.mulf %23, %24 : vector<1x256xf32>
    %cst_17 = arith.constant 2.400000e+00 : f32
    %26 = vector.broadcast %cst_17 : f32 to vector<1x256xf32>
    %27 = math.powf %25, %26 : vector<1x256xf32>
    %cst_18 = arith.constant 0.0773993805 : f32
    %28 = vector.broadcast %cst_18 : f32 to vector<1x256xf32>
    %29 = arith.mulf %6, %28 : vector<1x256xf32>
    %30 = arith.select %21, %27, %29 : vector<1x256xi1>, vector<1x256xf32>
    %cst_19 = arith.constant 4.045000e-02 : f32
    %31 = vector.broadcast %cst_19 : f32 to vector<1x256xf32>
    %32 = arith.cmpf ogt, %8, %31 : vector<1x256xf32>
    %cst_20 = arith.constant 5.500000e-02 : f32
    %33 = vector.broadcast %cst_20 : f32 to vector<1x256xf32>
    %34 = arith.addf %8, %33 : vector<1x256xf32>
    %cst_21 = arith.constant 0.947867274 : f32
    %35 = vector.broadcast %cst_21 : f32 to vector<1x256xf32>
    %36 = arith.mulf %34, %35 : vector<1x256xf32>
    %cst_22 = arith.constant 2.400000e+00 : f32
    %37 = vector.broadcast %cst_22 : f32 to vector<1x256xf32>
    %38 = math.powf %36, %37 : vector<1x256xf32>
    %cst_23 = arith.constant 0.0773993805 : f32
    %39 = vector.broadcast %cst_23 : f32 to vector<1x256xf32>
    %40 = arith.mulf %8, %39 : vector<1x256xf32>
    %41 = arith.select %32, %38, %40 : vector<1x256xi1>, vector<1x256xf32>
    %cst_24 = arith.constant 0.433946371 : f32
    %42 = vector.broadcast %cst_24 : f32 to vector<1x256xf32>
    %43 = arith.mulf %42, %19 : vector<1x256xf32>
    %cst_25 = arith.constant 0.376213878 : f32
    %44 = vector.broadcast %cst_25 : f32 to vector<1x256xf32>
    %45 = arith.mulf %44, %30 : vector<1x256xf32>
    %46 = arith.addf %43, %45 : vector<1x256xf32>
    %cst_26 = arith.constant 0.189825028 : f32
    %47 = vector.broadcast %cst_26 : f32 to vector<1x256xf32>
    %48 = arith.mulf %47, %41 : vector<1x256xf32>
    %49 = arith.addf %46, %48 : vector<1x256xf32>
    %cst_27 = arith.constant 8.856000e-03 : f32
    %50 = vector.broadcast %cst_27 : f32 to vector<1x256xf32>
    %51 = arith.maximumf %49, %50 : vector<1x256xf32>
    %cst_28 = arith.constant 0.333333343 : f32
    %52 = vector.broadcast %cst_28 : f32 to vector<1x256xf32>
    %53 = math.powf %51, %52 : vector<1x256xf32>
    %cst_29 = arith.constant 8.856000e-03 : f32
    %54 = vector.broadcast %cst_29 : f32 to vector<1x256xf32>
    %55 = arith.cmpf ogt, %49, %54 : vector<1x256xf32>
    %cst_30 = arith.constant 7.787000e+00 : f32
    %56 = vector.broadcast %cst_30 : f32 to vector<1x256xf32>
    %57 = arith.mulf %56, %49 : vector<1x256xf32>
    %cst_31 = arith.constant 0.137931034 : f32
    %58 = vector.broadcast %cst_31 : f32 to vector<1x256xf32>
    %59 = arith.addf %57, %58 : vector<1x256xf32>
    %60 = arith.select %55, %53, %59 : vector<1x256xi1>, vector<1x256xf32>
    %cst_32 = arith.constant 2.126710e-01 : f32
    %61 = vector.broadcast %cst_32 : f32 to vector<1x256xf32>
    %62 = arith.mulf %61, %19 : vector<1x256xf32>
    %cst_33 = arith.constant 7.151600e-01 : f32
    %63 = vector.broadcast %cst_33 : f32 to vector<1x256xf32>
    %64 = arith.mulf %63, %30 : vector<1x256xf32>
    %65 = arith.addf %62, %64 : vector<1x256xf32>
    %cst_34 = arith.constant 7.216900e-02 : f32
    %66 = vector.broadcast %cst_34 : f32 to vector<1x256xf32>
    %67 = arith.mulf %66, %41 : vector<1x256xf32>
    %68 = arith.addf %65, %67 : vector<1x256xf32>
    %cst_35 = arith.constant 8.856000e-03 : f32
    %69 = vector.broadcast %cst_35 : f32 to vector<1x256xf32>
    %70 = arith.maximumf %68, %69 : vector<1x256xf32>
    %cst_36 = arith.constant 0.333333343 : f32
    %71 = vector.broadcast %cst_36 : f32 to vector<1x256xf32>
    %72 = math.powf %70, %71 : vector<1x256xf32>
    %cst_37 = arith.constant 8.856000e-03 : f32
    %73 = vector.broadcast %cst_37 : f32 to vector<1x256xf32>
    %74 = arith.cmpf ogt, %68, %73 : vector<1x256xf32>
    %cst_38 = arith.constant 7.787000e+00 : f32
    %75 = vector.broadcast %cst_38 : f32 to vector<1x256xf32>
    %76 = arith.mulf %75, %68 : vector<1x256xf32>
    %cst_39 = arith.constant 0.137931034 : f32
    %77 = vector.broadcast %cst_39 : f32 to vector<1x256xf32>
    %78 = arith.addf %76, %77 : vector<1x256xf32>
    %79 = arith.select %74, %72, %78 : vector<1x256xi1>, vector<1x256xf32>
    %cst_40 = arith.constant 0.0177566744 : f32
    %80 = vector.broadcast %cst_40 : f32 to vector<1x256xf32>
    %81 = arith.mulf %80, %19 : vector<1x256xf32>
    %cst_41 = arith.constant 0.109468877 : f32
    %82 = vector.broadcast %cst_41 : f32 to vector<1x256xf32>
    %83 = arith.mulf %82, %30 : vector<1x256xf32>
    %84 = arith.addf %81, %83 : vector<1x256xf32>
    %cst_42 = arith.constant 0.872704625 : f32
    %85 = vector.broadcast %cst_42 : f32 to vector<1x256xf32>
    %86 = arith.mulf %85, %41 : vector<1x256xf32>
    %87 = arith.addf %84, %86 : vector<1x256xf32>
    %cst_43 = arith.constant 8.856000e-03 : f32
    %88 = vector.broadcast %cst_43 : f32 to vector<1x256xf32>
    %89 = arith.maximumf %87, %88 : vector<1x256xf32>
    %cst_44 = arith.constant 0.333333343 : f32
    %90 = vector.broadcast %cst_44 : f32 to vector<1x256xf32>
    %91 = math.powf %89, %90 : vector<1x256xf32>
    %cst_45 = arith.constant 8.856000e-03 : f32
    %92 = vector.broadcast %cst_45 : f32 to vector<1x256xf32>
    %93 = arith.cmpf ogt, %87, %92 : vector<1x256xf32>
    %cst_46 = arith.constant 7.787000e+00 : f32
    %94 = vector.broadcast %cst_46 : f32 to vector<1x256xf32>
    %95 = arith.mulf %94, %87 : vector<1x256xf32>
    %cst_47 = arith.constant 0.137931034 : f32
    %96 = vector.broadcast %cst_47 : f32 to vector<1x256xf32>
    %97 = arith.addf %95, %96 : vector<1x256xf32>
    %98 = arith.select %93, %91, %97 : vector<1x256xi1>, vector<1x256xf32>
    %cst_48 = arith.constant 1.160000e+02 : f32
    %99 = vector.broadcast %cst_48 : f32 to vector<1x256xf32>
    %100 = arith.mulf %99, %79 : vector<1x256xf32>
    %cst_49 = arith.constant 1.600000e+01 : f32
    %101 = vector.broadcast %cst_49 : f32 to vector<1x256xf32>
    %102 = arith.subf %100, %101 : vector<1x256xf32>
    %103 = arith.subf %60, %79 : vector<1x256xf32>
    %cst_50 = arith.constant 5.000000e+02 : f32
    %104 = vector.broadcast %cst_50 : f32 to vector<1x256xf32>
    %105 = arith.mulf %104, %103 : vector<1x256xf32>
    %106 = arith.subf %79, %98 : vector<1x256xf32>
    %cst_51 = arith.constant 2.000000e+02 : f32
    %107 = vector.broadcast %cst_51 : f32 to vector<1x256xf32>
    %108 = arith.mulf %107, %106 : vector<1x256xf32>
    %c0_52 = arith.constant 0 : index
    %c0_53 = arith.constant 0 : index
    %c0_54 = arith.constant 0 : index
    %c0_55 = arith.constant 0 : index
    %109 = vector.load %arg4[%c0_52, %c0_53, %c0_54, %c0_55] : memref<1x3x1x256xf32, #tpu.memory_space<vmem>>, vector<1x1x1x256xf32>
    %110 = vector.shape_cast %109 : vector<1x1x1x256xf32> to vector<1x256xf32>
    %111 = vector.shape_cast %102 : vector<1x256xf32> to vector<1x1x1x256xf32>
    tpu.vector_store %arg4[%c0_52, %c0_53, %c0_54, %c0_55], %111 {strides = array<i32>} : memref<1x3x1x256xf32, #tpu.memory_space<vmem>>, vector<1x1x1x256xf32>,
    %c0_56 = arith.constant 0 : index
    %c1_57 = arith.constant 1 : index
    %c0_58 = arith.constant 0 : index
    %c0_59 = arith.constant 0 : index
    %112 = vector.load %arg4[%c0_56, %c1_57, %c0_58, %c0_59] : memref<1x3x1x256xf32, #tpu.memory_space<vmem>>, vector<1x1x1x256xf32>
    %113 = vector.shape_cast %112 : vector<1x1x1x256xf32> to vector<1x256xf32>
    %114 = vector.shape_cast %105 : vector<1x256xf32> to vector<1x1x1x256xf32>
    tpu.vector_store %arg4[%c0_56, %c1_57, %c0_58, %c0_59], %114 {strides = array<i32>} : memref<1x3x1x256xf32, #tpu.memory_space<vmem>>, vector<1x1x1x256xf32>,
    %c0_60 = arith.constant 0 : index
    %c2_61 = arith.constant 2 : index
    %c0_62 = arith.constant 0 : index
    %c0_63 = arith.constant 0 : index
    %115 = vector.load %arg4[%c0_60, %c2_61, %c0_62, %c0_63] : memref<1x3x1x256xf32, #tpu.memory_space<vmem>>, vector<1x1x1x256xf32>
    %116 = vector.shape_cast %115 : vector<1x1x1x256xf32> to vector<1x256xf32>
    %117 = vector.shape_cast %108 : vector<1x256xf32> to vector<1x1x1x256xf32>
    tpu.vector_store %arg4[%c0_60, %c2_61, %c0_62, %c0_63], %117 {strides = array<i32>} : memref<1x3x1x256xf32, #tpu.memory_space<vmem>>, vector<1x1x1x256xf32>,
    %cst_64 = arith.constant 6.400000e+01 : f32
    %118 = vector.broadcast %cst_64 : f32 to vector<1x256xf32>
    %119 = arith.subf %102, %118 : vector<1x256xf32>
    %cst_65 = arith.constant 2.000000e+01 : f32
    %120 = vector.broadcast %cst_65 : f32 to vector<1x256xf32>
    %121 = arith.subf %105, %120 : vector<1x256xf32>
    %cst_66 = arith.constant -1.000000e+01 : f32
    %122 = vector.broadcast %cst_66 : f32 to vector<1x256xf32>
    %123 = arith.subf %108, %122 : vector<1x256xf32>
    %cst_67 = arith.constant dense<0.000000e+00> : vector<256xf32>
    %124 = vector.multi_reduction <add>, %119, %cst_67 [0] : vector<1x256xf32> to vector<256xf32>
    %125 = vector.shape_cast %124 : vector<256xf32> to vector<1x256xf32>
    %cst_68 = arith.constant dense<0.000000e+00> : vector<256xf32>
    %126 = vector.multi_reduction <add>, %121, %cst_68 [0] : vector<1x256xf32> to vector<256xf32>
    %127 = vector.shape_cast %126 : vector<256xf32> to vector<1x256xf32>
    %cst_69 = arith.constant dense<0.000000e+00> : vector<256xf32>
    %128 = vector.multi_reduction <add>, %123, %cst_69 [0] : vector<1x256xf32> to vector<256xf32>
    %129 = vector.shape_cast %128 : vector<256xf32> to vector<1x256xf32>
    %130 = arith.mulf %119, %119 : vector<1x256xf32>
    %cst_70 = arith.constant dense<0.000000e+00> : vector<256xf32>
    %131 = vector.multi_reduction <add>, %130, %cst_70 [0] : vector<1x256xf32> to vector<256xf32>
    %132 = vector.shape_cast %131 : vector<256xf32> to vector<1x256xf32>
    %133 = arith.mulf %121, %121 : vector<1x256xf32>
    %cst_71 = arith.constant dense<0.000000e+00> : vector<256xf32>
    %134 = vector.multi_reduction <add>, %133, %cst_71 [0] : vector<1x256xf32> to vector<256xf32>
    %135 = vector.shape_cast %134 : vector<256xf32> to vector<1x256xf32>
    %136 = arith.mulf %123, %123 : vector<1x256xf32>
    %cst_72 = arith.constant dense<0.000000e+00> : vector<256xf32>
    %137 = vector.multi_reduction <add>, %136, %cst_72 [0] : vector<1x256xf32> to vector<256xf32>
    %138 = vector.shape_cast %137 : vector<256xf32> to vector<1x256xf32>
    %139 = tpu.concatenate %125, %127, %129, %132, %135, %138 in 0 : vector<1x256xf32>, vector<1x256xf32>, vector<1x256xf32>, vector<1x256xf32>, vector<1x256xf32>, vector<1x256xf32> -> vector<6x256xf32>
    %c0_73 = arith.constant 0 : index
    %c0_74 = arith.constant 0 : index
    %c0_75 = arith.constant 0 : index
    %c0_76 = arith.constant 0 : index
    %140 = vector.load %arg5[%c0_73, %c0_74, %c0_75, %c0_76] : memref<1x1x6x256xf32, #tpu.memory_space<vmem>>, vector<1x1x6x256xf32>
    %141 = vector.shape_cast %140 : vector<1x1x6x256xf32> to vector<6x256xf32>
    %142 = arith.addf %141, %139 : vector<6x256xf32>
    %c0_77 = arith.constant 0 : index
    %c0_78 = arith.constant 0 : index
    %c0_79 = arith.constant 0 : index
    %c0_80 = arith.constant 0 : index
    %143 = vector.load %arg5[%c0_77, %c0_78, %c0_79, %c0_80] : memref<1x1x6x256xf32, #tpu.memory_space<vmem>>, vector<1x1x6x256xf32>
    %144 = vector.shape_cast %143 : vector<1x1x6x256xf32> to vector<6x256xf32>
    %145 = vector.shape_cast %142 : vector<6x256xf32> to vector<1x1x6x256xf32>
    tpu.vector_store %arg5[%c0_77, %c0_78, %c0_79, %c0_80], %145 {strides = array<i32>} : memref<1x1x6x256xf32, #tpu.memory_space<vmem>>, vector<1x1x6x256xf32>,
    return
  }
  func.func @transform_0(%arg0: i32, %arg1: i32, %arg2: i32) -> (i32, i32, i32, i32) {
    %c1_i32 = arith.constant 1 : i32
    %0 = arith.muli %arg1, %c1_i32 : i32
    %1 = arith.addi %0, %arg2 : i32
    %c0_i32 = arith.constant 0 : i32
    %c0_i32_0 = arith.constant 0 : i32
    %c0_i32_1 = arith.constant 0 : i32
    return %arg0, %c0_i32, %1, %c0_i32_0 : i32, i32, i32, i32
  }
  func.func @transform_1(%arg0: i32, %arg1: i32, %arg2: i32) -> (i32, i32, i32, i32) {
    %c1_i32 = arith.constant 1 : i32
    %0 = arith.muli %arg1, %c1_i32 : i32
    %1 = arith.addi %0, %arg2 : i32
    %c0_i32 = arith.constant 0 : i32
    %c0_i32_0 = arith.constant 0 : i32
    %c0_i32_1 = arith.constant 0 : i32
    return %arg0, %c0_i32, %1, %c0_i32_0 : i32, i32, i32, i32
  }
  func.func @transform_2(%arg0: i32, %arg1: i32, %arg2: i32) -> (i32, i32, i32, i32) {
    %c0_i32 = arith.constant 0 : i32
    %c0_i32_0 = arith.constant 0 : i32
    %c0_i32_1 = arith.constant 0 : i32
    return %arg0, %arg1, %c0_i32, %c0_i32_0 : i32, i32, i32, i32
  }
}

module attributes {stable_mosaic.version = 11 : i64} {
  func.func @_lab_norm_to_rgb_kernel(%arg0: i32, %arg1: i32, %arg2: memref<1x3x1x256xf32, #tpu.memory_space<vmem>>, %arg3: memref<2x3xf32, #tpu.memory_space<smem>>, %arg4: memref<2x3xf32, #tpu.memory_space<smem>>, %arg5: memref<1x3x1x256xf32, #tpu.memory_space<vmem>>) attributes {dimension_semantics = [#tpu.dimension_semantics<parallel>, #tpu.dimension_semantics<parallel>], iteration_bounds = array<i64: 2, 1>, scalar_prefetch = 0 : i64, scratch_operands = 0 : i64, tpu.core_type = #tpu.core_type<tc>, window_params = [{transform_indices = @transform_0, window_bounds = array<i64: 1, 3, 1, 256>}, {transform_indices = @transform_1, window_bounds = array<i64: 2, 3>}, {transform_indices = @transform_2, window_bounds = array<i64: 2, 3>}, {transform_indices = @transform_3, window_bounds = array<i64: 1, 3, 1, 256>}]} {
    %c0 = arith.constant 0 : index
    %c0_0 = arith.constant 0 : index
    %c0_1 = arith.constant 0 : index
    %c0_2 = arith.constant 0 : index
    %0 = vector.load %arg2[%c0, %c0_0, %c0_1, %c0_2] : memref<1x3x1x256xf32, #tpu.memory_space<vmem>>, vector<1x1x1x256xf32>
    %1 = vector.shape_cast %0 : vector<1x1x1x256xf32> to vector<1x256xf32>
    %2 = arith.index_cast %arg0 : i32 to index
    %c0_3 = arith.constant 0 : index
    %3 = memref.load %arg3[%2, %c0_3] : memref<2x3xf32, #tpu.memory_space<smem>>
    %4 = vector.broadcast %3 : f32 to vector<1x256xf32>
    %5 = arith.mulf %1, %4 : vector<1x256xf32>
    %6 = arith.index_cast %arg0 : i32 to index
    %c0_4 = arith.constant 0 : index
    %7 = memref.load %arg4[%6, %c0_4] : memref<2x3xf32, #tpu.memory_space<smem>>
    %8 = vector.broadcast %7 : f32 to vector<1x256xf32>
    %9 = arith.addf %5, %8 : vector<1x256xf32>
    %c0_5 = arith.constant 0 : index
    %c1 = arith.constant 1 : index
    %c0_6 = arith.constant 0 : index
    %c0_7 = arith.constant 0 : index
    %10 = vector.load %arg2[%c0_5, %c1, %c0_6, %c0_7] : memref<1x3x1x256xf32, #tpu.memory_space<vmem>>, vector<1x1x1x256xf32>
    %11 = vector.shape_cast %10 : vector<1x1x1x256xf32> to vector<1x256xf32>
    %12 = arith.index_cast %arg0 : i32 to index
    %c1_8 = arith.constant 1 : index
    %13 = memref.load %arg3[%12, %c1_8] : memref<2x3xf32, #tpu.memory_space<smem>>
    %14 = vector.broadcast %13 : f32 to vector<1x256xf32>
    %15 = arith.mulf %11, %14 : vector<1x256xf32>
    %16 = arith.index_cast %arg0 : i32 to index
    %c1_9 = arith.constant 1 : index
    %17 = memref.load %arg4[%16, %c1_9] : memref<2x3xf32, #tpu.memory_space<smem>>
    %18 = vector.broadcast %17 : f32 to vector<1x256xf32>
    %19 = arith.addf %15, %18 : vector<1x256xf32>
    %c0_10 = arith.constant 0 : index
    %c2 = arith.constant 2 : index
    %c0_11 = arith.constant 0 : index
    %c0_12 = arith.constant 0 : index
    %20 = vector.load %arg2[%c0_10, %c2, %c0_11, %c0_12] : memref<1x3x1x256xf32, #tpu.memory_space<vmem>>, vector<1x1x1x256xf32>
    %21 = vector.shape_cast %20 : vector<1x1x1x256xf32> to vector<1x256xf32>
    %22 = arith.index_cast %arg0 : i32 to index
    %c2_13 = arith.constant 2 : index
    %23 = memref.load %arg3[%22, %c2_13] : memref<2x3xf32, #tpu.memory_space<smem>>
    %24 = vector.broadcast %23 : f32 to vector<1x256xf32>
    %25 = arith.mulf %21, %24 : vector<1x256xf32>
    %26 = arith.index_cast %arg0 : i32 to index
    %c2_14 = arith.constant 2 : index
    %27 = memref.load %arg4[%26, %c2_14] : memref<2x3xf32, #tpu.memory_space<smem>>
    %28 = vector.broadcast %27 : f32 to vector<1x256xf32>
    %29 = arith.addf %25, %28 : vector<1x256xf32>
    %cst = arith.constant 1.600000e+01 : f32
    %30 = vector.broadcast %cst : f32 to vector<1x256xf32>
    %31 = arith.addf %9, %30 : vector<1x256xf32>
    %cst_15 = arith.constant 8.620690e-03 : f32
    %32 = vector.broadcast %cst_15 : f32 to vector<1x256xf32>
    %33 = arith.mulf %31, %32 : vector<1x256xf32>
    %cst_16 = arith.constant 2.000000e-03 : f32
    %34 = vector.broadcast %cst_16 : f32 to vector<1x256xf32>
    %35 = arith.mulf %19, %34 : vector<1x256xf32>
    %36 = arith.addf %35, %33 : vector<1x256xf32>
    %cst_17 = arith.constant 5.000000e-03 : f32
    %37 = vector.broadcast %cst_17 : f32 to vector<1x256xf32>
    %38 = arith.mulf %29, %37 : vector<1x256xf32>
    %39 = arith.subf %33, %38 : vector<1x256xf32>
    %cst_18 = arith.constant 0.000000e+00 : f32
    %40 = vector.broadcast %cst_18 : f32 to vector<1x256xf32>
    %41 = arith.maximumf %39, %40 : vector<1x256xf32>
    %cst_19 = arith.constant 0.206896603 : f32
    %42 = vector.broadcast %cst_19 : f32 to vector<1x256xf32>
    %43 = arith.cmpf ogt, %36, %42 : vector<1x256xf32>
    %44 = arith.mulf %36, %36 : vector<1x256xf32>
    %45 = arith.mulf %44, %36 : vector<1x256xf32>
    %cst_20 = arith.constant 0.137931034 : f32
    %46 = vector.broadcast %cst_20 : f32 to vector<1x256xf32>
    %47 = arith.subf %36, %46 : vector<1x256xf32>
    %cst_21 = arith.constant 0.128419161 : f32
    %48 = vector.broadcast %cst_21 : f32 to vector<1x256xf32>
    %49 = arith.mulf %47, %48 : vector<1x256xf32>
    %50 = arith.select %43, %45, %49 : vector<1x256xi1>, vector<1x256xf32>
    %cst_22 = arith.constant 0.206896603 : f32
    %51 = vector.broadcast %cst_22 : f32 to vector<1x256xf32>
    %52 = arith.cmpf ogt, %33, %51 : vector<1x256xf32>
    %53 = arith.mulf %33, %33 : vector<1x256xf32>
    %54 = arith.mulf %53, %33 : vector<1x256xf32>
    %cst_23 = arith.constant 0.137931034 : f32
    %55 = vector.broadcast %cst_23 : f32 to vector<1x256xf32>
    %56 = arith.subf %33, %55 : vector<1x256xf32>
    %cst_24 = arith.constant 0.128419161 : f32
    %57 = vector.broadcast %cst_24 : f32 to vector<1x256xf32>
    %58 = arith.mulf %56, %57 : vector<1x256xf32>
    %59 = arith.select %52, %54, %58 : vector<1x256xi1>, vector<1x256xf32>
    %cst_25 = arith.constant 0.206896603 : f32
    %60 = vector.broadcast %cst_25 : f32 to vector<1x256xf32>
    %61 = arith.cmpf ogt, %41, %60 : vector<1x256xf32>
    %62 = arith.mulf %41, %41 : vector<1x256xf32>
    %63 = arith.mulf %62, %41 : vector<1x256xf32>
    %cst_26 = arith.constant 0.137931034 : f32
    %64 = vector.broadcast %cst_26 : f32 to vector<1x256xf32>
    %65 = arith.subf %41, %64 : vector<1x256xf32>
    %cst_27 = arith.constant 0.128419161 : f32
    %66 = vector.broadcast %cst_27 : f32 to vector<1x256xf32>
    %67 = arith.mulf %65, %66 : vector<1x256xf32>
    %68 = arith.select %61, %63, %67 : vector<1x256xi1>, vector<1x256xf32>
    %cst_28 = arith.constant 3.07998037 : f32
    %69 = vector.broadcast %cst_28 : f32 to vector<1x256xf32>
    %70 = arith.mulf %69, %50 : vector<1x256xf32>
    %cst_29 = arith.constant -1.53715158 : f32
    %71 = vector.broadcast %cst_29 : f32 to vector<1x256xf32>
    %72 = arith.mulf %71, %59 : vector<1x256xf32>
    %73 = arith.addf %70, %72 : vector<1x256xf32>
    %cst_30 = arith.constant -0.542821288 : f32
    %74 = vector.broadcast %cst_30 : f32 to vector<1x256xf32>
    %75 = arith.mulf %74, %68 : vector<1x256xf32>
    %76 = arith.addf %73, %75 : vector<1x256xf32>
    %cst_31 = arith.constant -0.92124778 : f32
    %77 = vector.broadcast %cst_31 : f32 to vector<1x256xf32>
    %78 = arith.mulf %77, %50 : vector<1x256xf32>
    %cst_32 = arith.constant 1.875990e+00 : f32
    %79 = vector.broadcast %cst_32 : f32 to vector<1x256xf32>
    %80 = arith.mulf %79, %59 : vector<1x256xf32>
    %81 = arith.addf %78, %80 : vector<1x256xf32>
    %cst_33 = arith.constant 0.0452473387 : f32
    %82 = vector.broadcast %cst_33 : f32 to vector<1x256xf32>
    %83 = arith.mulf %82, %68 : vector<1x256xf32>
    %84 = arith.addf %81, %83 : vector<1x256xf32>
    %cst_34 = arith.constant 0.0528904609 : f32
    %85 = vector.broadcast %cst_34 : f32 to vector<1x256xf32>
    %86 = arith.mulf %85, %50 : vector<1x256xf32>
    %cst_35 = arith.constant -0.204041332 : f32
    %87 = vector.broadcast %cst_35 : f32 to vector<1x256xf32>
    %88 = arith.mulf %87, %59 : vector<1x256xf32>
    %89 = arith.addf %86, %88 : vector<1x256xf32>
    %cst_36 = arith.constant 1.151232 : f32
    %90 = vector.broadcast %cst_36 : f32 to vector<1x256xf32>
    %91 = arith.mulf %90, %68 : vector<1x256xf32>
    %92 = arith.addf %89, %91 : vector<1x256xf32>
    %cst_37 = arith.constant 3.130800e-03 : f32
    %93 = vector.broadcast %cst_37 : f32 to vector<1x256xf32>
    %94 = arith.cmpf ogt, %76, %93 : vector<1x256xf32>
    %cst_38 = arith.constant 3.130800e-03 : f32
    %95 = vector.broadcast %cst_38 : f32 to vector<1x256xf32>
    %96 = arith.maximumf %76, %95 : vector<1x256xf32>
    %cst_39 = arith.constant 0.416666657 : f32
    %97 = vector.broadcast %cst_39 : f32 to vector<1x256xf32>
    %98 = math.powf %96, %97 : vector<1x256xf32>
    %cst_40 = arith.constant 1.055000e+00 : f32
    %99 = vector.broadcast %cst_40 : f32 to vector<1x256xf32>
    %100 = arith.mulf %99, %98 : vector<1x256xf32>
    %cst_41 = arith.constant 5.500000e-02 : f32
    %101 = vector.broadcast %cst_41 : f32 to vector<1x256xf32>
    %102 = arith.subf %100, %101 : vector<1x256xf32>
    %cst_42 = arith.constant 1.292000e+01 : f32
    %103 = vector.broadcast %cst_42 : f32 to vector<1x256xf32>
    %104 = arith.mulf %103, %76 : vector<1x256xf32>
    %105 = arith.select %94, %102, %104 : vector<1x256xi1>, vector<1x256xf32>
    %cst_43 = arith.constant 0.000000e+00 : f32
    %cst_44 = arith.constant 1.000000e+00 : f32
    %106 = vector.broadcast %cst_43 : f32 to vector<1x256xf32>
    %107 = arith.maximumf %106, %105 : vector<1x256xf32>
    %108 = vector.broadcast %cst_44 : f32 to vector<1x256xf32>
    %109 = arith.minimumf %108, %107 : vector<1x256xf32>
    %c0_45 = arith.constant 0 : index
    %c0_46 = arith.constant 0 : index
    %c0_47 = arith.constant 0 : index
    %c0_48 = arith.constant 0 : index
    %110 = vector.load %arg5[%c0_45, %c0_46, %c0_47, %c0_48] : memref<1x3x1x256xf32, #tpu.memory_space<vmem>>, vector<1x1x1x256xf32>
    %111 = vector.shape_cast %110 : vector<1x1x1x256xf32> to vector<1x256xf32>
    %112 = vector.shape_cast %109 : vector<1x256xf32> to vector<1x1x1x256xf32>
    tpu.vector_store %arg5[%c0_45, %c0_46, %c0_47, %c0_48], %112 {strides = array<i32>} : memref<1x3x1x256xf32, #tpu.memory_space<vmem>>, vector<1x1x1x256xf32>,
    %cst_49 = arith.constant 3.130800e-03 : f32
    %113 = vector.broadcast %cst_49 : f32 to vector<1x256xf32>
    %114 = arith.cmpf ogt, %84, %113 : vector<1x256xf32>
    %cst_50 = arith.constant 3.130800e-03 : f32
    %115 = vector.broadcast %cst_50 : f32 to vector<1x256xf32>
    %116 = arith.maximumf %84, %115 : vector<1x256xf32>
    %cst_51 = arith.constant 0.416666657 : f32
    %117 = vector.broadcast %cst_51 : f32 to vector<1x256xf32>
    %118 = math.powf %116, %117 : vector<1x256xf32>
    %cst_52 = arith.constant 1.055000e+00 : f32
    %119 = vector.broadcast %cst_52 : f32 to vector<1x256xf32>
    %120 = arith.mulf %119, %118 : vector<1x256xf32>
    %cst_53 = arith.constant 5.500000e-02 : f32
    %121 = vector.broadcast %cst_53 : f32 to vector<1x256xf32>
    %122 = arith.subf %120, %121 : vector<1x256xf32>
    %cst_54 = arith.constant 1.292000e+01 : f32
    %123 = vector.broadcast %cst_54 : f32 to vector<1x256xf32>
    %124 = arith.mulf %123, %84 : vector<1x256xf32>
    %125 = arith.select %114, %122, %124 : vector<1x256xi1>, vector<1x256xf32>
    %cst_55 = arith.constant 0.000000e+00 : f32
    %cst_56 = arith.constant 1.000000e+00 : f32
    %126 = vector.broadcast %cst_55 : f32 to vector<1x256xf32>
    %127 = arith.maximumf %126, %125 : vector<1x256xf32>
    %128 = vector.broadcast %cst_56 : f32 to vector<1x256xf32>
    %129 = arith.minimumf %128, %127 : vector<1x256xf32>
    %c0_57 = arith.constant 0 : index
    %c1_58 = arith.constant 1 : index
    %c0_59 = arith.constant 0 : index
    %c0_60 = arith.constant 0 : index
    %130 = vector.load %arg5[%c0_57, %c1_58, %c0_59, %c0_60] : memref<1x3x1x256xf32, #tpu.memory_space<vmem>>, vector<1x1x1x256xf32>
    %131 = vector.shape_cast %130 : vector<1x1x1x256xf32> to vector<1x256xf32>
    %132 = vector.shape_cast %129 : vector<1x256xf32> to vector<1x1x1x256xf32>
    tpu.vector_store %arg5[%c0_57, %c1_58, %c0_59, %c0_60], %132 {strides = array<i32>} : memref<1x3x1x256xf32, #tpu.memory_space<vmem>>, vector<1x1x1x256xf32>,
    %cst_61 = arith.constant 3.130800e-03 : f32
    %133 = vector.broadcast %cst_61 : f32 to vector<1x256xf32>
    %134 = arith.cmpf ogt, %92, %133 : vector<1x256xf32>
    %cst_62 = arith.constant 3.130800e-03 : f32
    %135 = vector.broadcast %cst_62 : f32 to vector<1x256xf32>
    %136 = arith.maximumf %92, %135 : vector<1x256xf32>
    %cst_63 = arith.constant 0.416666657 : f32
    %137 = vector.broadcast %cst_63 : f32 to vector<1x256xf32>
    %138 = math.powf %136, %137 : vector<1x256xf32>
    %cst_64 = arith.constant 1.055000e+00 : f32
    %139 = vector.broadcast %cst_64 : f32 to vector<1x256xf32>
    %140 = arith.mulf %139, %138 : vector<1x256xf32>
    %cst_65 = arith.constant 5.500000e-02 : f32
    %141 = vector.broadcast %cst_65 : f32 to vector<1x256xf32>
    %142 = arith.subf %140, %141 : vector<1x256xf32>
    %cst_66 = arith.constant 1.292000e+01 : f32
    %143 = vector.broadcast %cst_66 : f32 to vector<1x256xf32>
    %144 = arith.mulf %143, %92 : vector<1x256xf32>
    %145 = arith.select %134, %142, %144 : vector<1x256xi1>, vector<1x256xf32>
    %cst_67 = arith.constant 0.000000e+00 : f32
    %cst_68 = arith.constant 1.000000e+00 : f32
    %146 = vector.broadcast %cst_67 : f32 to vector<1x256xf32>
    %147 = arith.maximumf %146, %145 : vector<1x256xf32>
    %148 = vector.broadcast %cst_68 : f32 to vector<1x256xf32>
    %149 = arith.minimumf %148, %147 : vector<1x256xf32>
    %c0_69 = arith.constant 0 : index
    %c2_70 = arith.constant 2 : index
    %c0_71 = arith.constant 0 : index
    %c0_72 = arith.constant 0 : index
    %150 = vector.load %arg5[%c0_69, %c2_70, %c0_71, %c0_72] : memref<1x3x1x256xf32, #tpu.memory_space<vmem>>, vector<1x1x1x256xf32>
    %151 = vector.shape_cast %150 : vector<1x1x1x256xf32> to vector<1x256xf32>
    %152 = vector.shape_cast %149 : vector<1x256xf32> to vector<1x1x1x256xf32>
    tpu.vector_store %arg5[%c0_69, %c2_70, %c0_71, %c0_72], %152 {strides = array<i32>} : memref<1x3x1x256xf32, #tpu.memory_space<vmem>>, vector<1x1x1x256xf32>,
    return
  }
  func.func @transform_0(%arg0: i32, %arg1: i32) -> (i32, i32, i32, i32) {
    %c0_i32 = arith.constant 0 : i32
    %c0_i32_0 = arith.constant 0 : i32
    %c0_i32_1 = arith.constant 0 : i32
    return %arg0, %c0_i32, %arg1, %c0_i32_0 : i32, i32, i32, i32
  }
  func.func @transform_1(%arg0: i32, %arg1: i32) -> (i32, i32) {
    %c0_i32 = arith.constant 0 : i32
    %c0_i32_0 = arith.constant 0 : i32
    %c0_i32_1 = arith.constant 0 : i32
    return %c0_i32, %c0_i32_0 : i32, i32
  }
  func.func @transform_2(%arg0: i32, %arg1: i32) -> (i32, i32) {
    %c0_i32 = arith.constant 0 : i32
    %c0_i32_0 = arith.constant 0 : i32
    %c0_i32_1 = arith.constant 0 : i32
    return %c0_i32, %c0_i32_0 : i32, i32
  }
  func.func @transform_3(%arg0: i32, %arg1: i32) -> (i32, i32, i32, i32) {
    %c0_i32 = arith.constant 0 : i32
    %c0_i32_0 = arith.constant 0 : i32
    %c0_i32_1 = arith.constant 0 : i32
    return %arg0, %c0_i32, %arg1, %c0_i32_0 : i32, i32, i32, i32
  }
}

</mosaic_0001>

<bundles_post_ra>
// kernel: lab_prenorm.2
= control target key start
LH: loop header
LB: loop body
LE: loop exit
PB: predicated region body
PF: predicated region fallthrough
CT: control target
= control target key end

     0   :  { %s776_s9 = smov 0   ;;  %s778_s10 = smov 0   ;;  %s894_s0 = inlined_call_operand.vmem [shape: f32[2,3,1,256], index: 0, kind: input, shape index: {}]   ;;  %s895_s1 = inlined_call_operand.vmem [shape: f32[2,3,1,256], index: 1, kind: output, shape index: {0}]   ;;  %s896_s2 = inlined_call_operand.vmem [shape: f32[2,1,6,256], index: 2, kind: output, shape index: {1}]  }
   0x1   :  { %s780_s11 = smov 0  }
   0x2 LB: > { %s32_s12 = sadd.s32 1, %s754_s10  ;;  %p540_p0 = scmp.ge.s32.totalorder %s758_s11, 1  ;;  %s758_s11 = sphi %s780_s11, %s13_s11   ;;  %s754_s10 = sphi %s778_s10, %s904_s10   ;;  %s750_s9 = sphi %s776_s9, %s903_s9  }
   0x3   : > { %p34_p1 = scmp.ge.s32.totalorder %s32_s12, 2  ;;  %p149_p2 = scmp.lt.s32.totalorder %s758_s11, 3 }
   0x5   : > { %s906_s12 = smov (%p34_p1, %s32_s12), 0  ;;  %p150_p3 = pnand %p540_p0, %p149_p2 }
   0x6   : > { %p189_p4 = scmp.lt.s32.totalorder (!%p150_p3), %s750_s9, 1  ;;  %v760_v0 = vmov (!%p150_p3), 0.0  }
   0x7   : > { %153 = sbr.rel (%p150_p3) target bundleno = 116 (0x74), region = 24 }
   0xe   : > { %s908_s9 = smov (!%p189_p4, %s750_s9), 1 }
   0xf   : > { %s553_s13 = sshll.u32 %s908_s9, 4  ;;  %s554_s14 = smul.u32 6, %s908_s9 }
  0x10   : > { %s801_s17 = scalar_lea.vmem %s896_s2, %s553_s13 }
  0x11   : > { %221 = vst [vmem:[%s801_s17] sm:$0x3f] %v760_v0  ;;  %222 = vst [vmem:[%s801_s17 + $0x8] sm:$0x3f] %v760_v0  ;;  %s196_s20 = scalar_lea.vmem %s894_s0, %s554_s14  ;;  %s206_s23 = scalar_lea.vmem %s895_s1, %s554_s14 }
  0x12   : > { %v223_v1 = vld [vmem:[%s196_s20] sm:$0x3]  ;;  %v543_v2 = vld [vmem:[%s196_s20 + $0x2] sm:$0x3]  ;;  %v810_v3 = vld [vmem:[%s196_s20 + $0x4] sm:$0x3] }
  0x13   : > { %v229_v4 = vadd.f32 0.055, %v223_v1  ;;  %v235_v5 = vadd.f32 0.055, %v543_v2  ;;  %v241_v8 = vadd.f32 0.055, %v810_v3 }
  0x14   : > { %vm228_vm1 = vcmp.gt.f32.partialorder %v223_v1, 0.04045  ;;  %v232_v19 = vmul.f32 0.07739938, %v223_v1  ;;  %vm234_vm5 = vcmp.gt.f32.partialorder %v543_v2, 0.04045 }
  0x15   : > { %v230_v6 = vmul.f32 0.9478673, %v229_v4  ;;  %v236_v7 = vmul.f32 0.9478673, %v235_v5  ;;  %v242_v11 = vmul.f32 0.9478673, %v241_v8  ;;  %v285_v8 = vlaneseq }
  0x16   : > { %v238_v22 = vmul.f32 0.07739938, %v543_v2  ;;  %vm240_vm9 = vcmp.gt.f32.partialorder %v810_v3, 0.04045  ;;  %v244_v32 = vmul.f32 0.07739938, %v810_v3 }
  0x17   : > { %v559_v9 = vand.u32 2147483647, %v230_v6  ;;  %v585_v10 = vand.u32 2147483647, %v236_v7  ;;  %v611_v12 = vand.u32 2147483647, %v242_v11  ;;  %vm576_vm7 = vcmp.ne.f32.partialorder %v230_v6, %v230_v6 }
  0x18   : > { %vm563_vm0 = vcmp.lt.f32.partialorder %v230_v6, 0  ;;  %vm564_vm2 = vcmp.eq.f32.partialorder %v230_v6, 0  ;;  %vm589_vm3 = vcmp.lt.f32.partialorder %v236_v7, 0  ;;  %vm590_vm6 = vcmp.eq.f32.partialorder %v236_v7, 0 }
  0x19   : > { %712 = vlog2.f32 %v559_v9  ;;  %vm813_vm4 = vcmp.eq.f32.partialorder %v559_v9, 2139095040  ;;  %vm817_vm8 = vcmp.eq.f32.partialorder %v585_v10, 2139095040  ;;  %vm565_vm10 = vcmp.eq.f32.partialorder %v230_v6, 1065353216 }
  0x1a   : > { %714 = vlog2.f32 %v585_v10  ;;  %vm602_vm11 = vcmp.ne.f32.partialorder %v236_v7, %v236_v7  ;;  %vm591_vm12 = vcmp.eq.f32.partialorder %v236_v7, 1065353216  ;;  %vm615_vm13 = vcmp.lt.f32.partialorder %v242_v11, 0 }
  0x1b   : > { %716 = vlog2.f32 %v611_v12  ;;  %vm616_vm14 = vcmp.eq.f32.partialorder %v242_v11, 0  ;;  %vm617_vm15 = vcmp.eq.f32.partialorder %v242_v11, 1065353216 }
  0x23   : > { %v713_v13 = vpop.eup %712 }
  0x24   : > { %v715_v14 = vpop.eup %714  ;;  %v561_v15 = vmul.f32 2.4, %v713_v13  ;;  %v308_v13 = vshrl.u32 %v285_v8, 7 }
  0x25   : > { %v587_v16 = vmul.f32 2.4, %v715_v14  ;;  %v717_v17 = vpop.eup %716 }
  0x26   : > { %718 = vpow2.f32 %v561_v15  ;;  %v613_v18 = vmul.f32 2.4, %v717_v17 }
  0x27   : > { %720 = vpow2.f32 %v587_v16 }
  0x28   : > { %722 = vpow2.f32 %v613_v18 }
  0x30   : > { %v719_v20 = vpop.eup %718 }
  0x31   : > { %v721_v23 = vpop.eup %720  ;;  %v569_v24 = vsel %vm563_vm0, 2143289344, %v719_v20  ;;  %vm620_vm0 = vcmp.eq.f32.partialorder %v611_v12, 2139095040 }
  0x32   : > { %v570_v26 = vsel %vm564_vm2, 0, %v569_v24  ;;  %v595_v27 = vsel %vm589_vm3, 2143289344, %v721_v23  ;;  %v723_v33 = vpop.eup %722  ;;  %vm628_vm2 = vcmp.ne.f32.partialorder %v242_v11, %v242_v11 }
  0x33   : > { %v575_v28 = vsel %vm813_vm4, 2139095040, %v570_v26  ;;  %v596_v29 = vsel %vm590_vm6, 0, %v595_v27  ;;  %v621_v38 = vsel %vm615_vm13, 2143289344, %v723_v33 }
  0x34   : > { %v579_v30 = vsel %vm576_vm7, 2143289344, %v575_v28  ;;  %v601_v31 = vsel %vm817_vm8, 2139095040, %v596_v29  ;;  %v622_v40 = vsel %vm616_vm14, 0, %v621_v38 }
  0x35   : > { %v580_v34 = vsel %vm565_vm10, 1065353216, %v579_v30  ;;  %v605_v35 = vsel %vm602_vm11, 2143289344, %v601_v31  ;;  %v627_v43 = vsel %vm620_vm0, 2139095040, %v622_v40  ;;  %vm857_vm0 = vcmp.lt.s32.totalorder %v285_v8, 256 }
  0x36   : > { %v233_v36 = vsel %vm228_vm1, %v580_v34, %v232_v19  ;;  %v606_v37 = vsel %vm591_vm12, 1065353216, %v605_v35  ;;  %v631_v46 = vsel %vm628_vm2, 2143289344, %v627_v43  ;;  %v309_v43 = vsub.s32 0, %v308_v13 }
  0x37   : > { %v239_v39 = vsel %vm234_vm5, %v606_v37, %v238_v22  ;;  %v246_v41 = vmul.f32 0.43394637, %v233_v36  ;;  %v257_v42 = vmul.f32 0.212671, %v233_v36  ;;  %v268_v47 = vmul.f32 0.017756674, %v233_v36 }
  0x38   : > { %v247_v44 = vmul.f32 0.37621388, %v239_v39  ;;  %v258_v45 = vmul.f32 0.71516, %v239_v39  ;;  %v632_v48 = vsel %vm617_vm15, 1065353216, %v631_v46 }
  0x39   : > { %v269_v50 = vmul.f32 0.10946888, %v239_v39  ;;  %v245_v52 = vsel %vm240_vm9, %v632_v48, %v244_v32 }
  0x3a   : > { %v259_v49 = vadd.f32 %v258_v45, %v257_v42  ;;  %v248_v51 = vadd.f32 %v247_v44, %v246_v41  ;;  %v260_v53 = vmul.f32 0.072169, %v245_v52  ;;  %v249_v54 = vmul.f32 0.18982503, %v245_v52 }
  0x3b   : > { %v270_v57 = vadd.f32 %v269_v50, %v268_v47  ;;  %v271_v58 = vmul.f32 0.8727046, %v245_v52  ;;  %v313_v45 = vsub.s32 1, %v308_v13  ;;  %v388_v13 = vld [vmem:[%s801_s17 + $0x8] sm:$0x3f] }
  0x3c   : > { %v831_v55 = vadd.f32 %v260_v53, %v259_v49  ;;  %v833_v56 = vadd.f32 %v249_v54, %v248_v51 }
  0x3d   : > { %v837_v62 = vadd.f32 %v271_v58, %v270_v57 }
  0x3e   : > { %v262_v59 = vmax.f32 %v831_v55, 0.008856  ;;  %v251_v60 = vmax.f32 %v833_v56, 0.008856  ;;  %v265_v11 = vmul.f32 7.787, %v831_v55 }
  0x3f   : > { %v840_v0 = vmax.f32 %v837_v62, 0.008856  ;;  %vm264_vm3 = vcmp.gt.f32.partialorder %v831_v55, 0.008856  ;;  %vm253_vm4 = vcmp.gt.f32.partialorder %v833_v56, 0.008856 }
  0x40   : > { %v653_v61 = vand.u32 2147483647, %v262_v59  ;;  %v635_v63 = vand.u32 2147483647, %v251_v60  ;;  %v657_v9 = vand.u32 2147483648, %v262_v59  ;;  %v639_v10 = vand.u32 2147483648, %v251_v60 }
  0x41   : > { %v843_v1 = vand.u32 2147483647, %v840_v0  ;;  %v254_v16 = vmul.f32 7.787, %v833_v56  ;;  %vm651_vm7 = vcmp.eq.f32.partialorder %v262_v59, 0.0  ;;  %vm652_vm8 = vcmp.lt.f32.partialorder %v262_v59, 0.0 }
  0x42   : > { %724 = vlog2.f32 %v653_v61  ;;  %vm661_vm1 = vweird.f32 %v653_v61  ;;  %vm663_vm5 = vcmp.eq.f32.partialorder %v653_v61, 0.0  ;;  %vm643_vm6 = vweird.f32 %v635_v63 }
  0x43   : > { %726 = vlog2.f32 %v635_v63  ;;  %vm645_vm9 = vcmp.eq.f32.partialorder %v635_v63, 0.0  ;;  %v266_v19 = vadd.f32 0.13793103, %v265_v11  ;;  %vm634_vm10 = vcmp.lt.f32.partialorder %v251_v60, 0.0  ;;  %v387_v11 = vld [vmem:[%s801_s17] sm:$0x3f] }
  0x44   : > { %728 = vlog2.f32 %v843_v1  ;;  %v675_v20 = vand.u32 2147483648, %v840_v0  ;;  %vm654_vm11 = vcmp.eq.f32.partialorder %v653_v61, inf  ;;  %vm633_vm12 = vcmp.eq.f32.partialorder %v251_v60, 0.0 }
  0x45   : > { %vm636_vm13 = vcmp.eq.f32.partialorder %v635_v63, inf  ;;  %v255_v25 = vadd.f32 0.13793103, %v254_v16  ;;  %vm679_vm14 = vweird.f32 %v843_v1  ;;  %v276_v29 = vmul.f32 7.787, %v837_v62 }
  0x46   : > { %vm681_vm15 = vcmp.eq.f32.partialorder %v843_v1, 0.0  ;;  %vm670_vm2 = vcmp.lt.f32.partialorder %v840_v0, 0.0 }
  0x47   : > { %v277_v41 = vadd.f32 0.13793103, %v276_v29 }
  0x4c   : > { %v725_v2 = vpop.eup %724 }
  0x4d   : > { %v727_v3 = vpop.eup %726  ;;  %v658_v4 = vmul.f32 0.33333334, %v725_v2 }
  0x4e   : > { %v640_v5 = vmul.f32 0.33333334, %v727_v3  ;;  %v729_v6 = vpop.eup %728 }
  0x4f   : > { %730 = vpow2.f32 %v658_v4  ;;  %v676_v7 = vmul.f32 0.33333334, %v729_v6 }
  0x50   : > { %732 = vpow2.f32 %v640_v5 }
  0x51   : > { %734 = vpow2.f32 %v676_v7 }
  0x59   : > { %v731_v12 = vpop.eup %730 }
  0x5a   : > { %v733_v14 = vpop.eup %732  ;;  %v660_v15 = vor.u32 %v731_v12, %v657_v9 }
  0x5b   : > { %v642_v17 = vor.u32 %v733_v14, %v639_v10  ;;  %v735_v26 = vpop.eup %734 }
  0x5c   : > { %v662_v18 = vsel %vm661_vm1, %v262_v59, %v660_v15  ;;  %v678_v32 = vor.u32 %v735_v26, %v675_v20  ;;  %vm669_vm1 = vcmp.eq.f32.partialorder %v840_v0, 0.0 }
  0x5d   : > { %v665_v21 = vsel %vm663_vm5, %v657_v9, %v662_v18  ;;  %v644_v22 = vsel %vm643_vm6, %v251_v60, %v642_v17  ;;  %vm275_vm5 = vcmp.gt.f32.partialorder %v837_v62, 0.008856  ;;  %vm375_vm6 = vcmask 1041408  }
  0x5e   : > { %v666_v23 = vsel %vm652_vm8, nan, %v665_v21  ;;  %v647_v24 = vsel %vm645_vm9, %v639_v10, %v644_v22  ;;  %v680_v38 = vsel %vm679_vm14, %v840_v0, %v678_v32  ;;  %vm381_vm8 = vcmask 1043456  }
  0x5f   : > { %v667_v27 = vsel %vm651_vm7, 0.0, %v666_v23  ;;  %v648_v28 = vsel %vm634_vm10, nan, %v647_v24  ;;  %v683_v40 = vsel %vm681_vm15, %v675_v20, %v680_v38  ;;  %vm378_vm7 = vcmask 1042432  }
  0x60   : > { %v668_v30 = vsel %vm654_vm11, inf, %v667_v27  ;;  %v649_v31 = vsel %vm633_vm12, 0.0, %v648_v28  ;;  %v684_v44 = vsel %vm670_vm2, nan, %v683_v40  ;;  %vm384_vm9 = vcmask 1044480  }
  0x61   : > { %v267_v33 = vsel %vm264_vm3, %v668_v30, %v266_v19  ;;  %v650_v35 = vsel %vm636_vm13, inf, %v649_v31  ;;  %vm672_vm3 = vcmp.eq.f32.partialorder %v843_v1, inf  ;;  %v685_v47 = vsel %vm669_vm1, 0.0, %v684_v44 }
  0x62   : > { %v279_v36 = vmul.f32 116.0, %v267_v33  ;;  %v256_v37 = vsel %vm253_vm4, %v650_v35, %v255_v25  ;;  %v686_v49 = vsel %vm672_vm3, inf, %v685_v47  ;;  %vm372_vm4 = vcmask 1040384  }
  0x63   : > { %v281_v39 = vsub.f32 %v256_v37, %v267_v33  ;;  %v278_v51 = vsel %vm275_vm5, %v686_v49, %v277_v41 }
  0x64   : > { %v545_v42 = vadd.f32 -16.0, %v279_v36  ;;  %v283_v54 = vsub.f32 %v267_v33, %v278_v51 }
  0x65   : > { %v282_v46 = vmul.f32 500.0, %v281_v39 }
  0x66   : > { %289 = vst.msk [vmem:[%s206_s23] sm:$0x3] %vm857_vm0, %v545_v42  ;;  %v548_v48 = vadd.f32 -64.0, %v545_v42  ;;  %v284_v59 = vmul.f32 200.0, %v283_v54 }
  0x67   : > { %546 = vst.msk [vmem:[%s206_s23 + $0x2] sm:$0x3] %vm857_vm0, %v282_v46  ;;  %v549_v50 = vadd.f32 -20.0, %v282_v46 }
  0x68   : > { %v300_v52 = vmul.f32 %v548_v48, %v548_v48  ;;  %v310_v53 = vrot.slane %v548_v48, %v309_v43  ;;  %v314_v55 = vrot.slane %v548_v48, %v313_v45  ;;  %547 = vst.msk [vmem:[%s206_s23 + $0x4] sm:$0x3] %vm857_vm0, %v284_v59  ;;  %v550_v61 = vadd.f32 10.0, %v284_v59 }
  0x69   : > { %v302_v56 = vmul.f32 %v549_v50, %v549_v50  ;;  %v321_v57 = vrot.slane %v549_v50, %v309_v43  ;;  %v325_v58 = vrot.slane %v549_v50, %v313_v45 }
  0x6a   : > { %v343_v60 = vrot.slane %v300_v52, %v309_v43  ;;  %v347_v62 = vrot.slane %v300_v52, %v313_v45  ;;  %v304_v2 = vmul.f32 %v550_v61, %v550_v61  ;;  %v332_v3 = vrot.slane %v550_v61, %v309_v43 }
  0x6b   : > { %v354_v63 = vrot.slane %v302_v56, %v309_v43  ;;  %v373_v0 = vsel %vm372_vm4, %v310_v53, %v321_v57  ;;  %v374_v1 = vsel %vm372_vm4, %v314_v55, %v325_v58  ;;  %v336_v4 = vrot.slane %v550_v61, %v313_v45 }
  0x6c   : > { %v358_v5 = vrot.slane %v302_v56, %v313_v45  ;;  %v365_v6 = vrot.slane %v304_v2, %v309_v43  ;;  %v376_v7 = vsel %vm375_vm6, %v373_v0, %v332_v3  ;;  %v369_v8 = vrot.slane %v304_v2, %v313_v45 }
  0x6d   : > { %v377_v9 = vsel %vm375_vm6, %v374_v1, %v336_v4  ;;  %v379_v10 = vsel %vm378_vm7, %v376_v7, %v343_v60 }
  0x6e   : > { %v380_v12 = vsel %vm378_vm7, %v377_v9, %v347_v62  ;;  %v382_v14 = vsel %vm381_vm8, %v379_v10, %v354_v63 }
  0x6f   : > { %v383_v15 = vsel %vm381_vm8, %v380_v12, %v358_v5  ;;  %v385_v16 = vsel %vm384_vm9, %v382_v14, %v365_v6 }
  0x70   : > { %v386_v17 = vsel %vm384_vm9, %v383_v15, %v369_v8  ;;  %v389_v18 = vadd.f32 %v387_v11, %v385_v16 }
  0x71   : > { %v390_v19 = vadd.f32 %v388_v13, %v386_v17 }
  0x72   : > { %391 = vst [vmem:[%s801_s17] sm:$0x3f] %v389_v18 }
  0x73   : > { %392 = vst [vmem:[%s801_s17 + $0x8] sm:$0x3f] %v390_v19 }
  0x74 PF: > { %s13_s11 = sadd.s32 1, %s758_s11   ;;  %s903_s9 = smov %s754_s10 }
  0x75   : > { %p10_p5 = scmp.ge.s32.totalorder %s13_s11, 4   ;;  %s904_s10 = smov %s906_s12 }
  0x77   :  { %12 = sbr.rel (!%p10_p5) target bundleno = 2 (0x2), region = 74 }

// kernel: lab_prenorm.3
= control target key start
LH: loop header
LB: loop body
LE: loop exit
PB: predicated region body
PF: predicated region fallthrough
CT: control target
= control target key end

     0   :  { %8 = vsyncpa [#allocation3], 0  ;;  %s792_s0 = inlined_call_operand.vmem [shape: f32[2,3,1,256], index: 0, kind: input, shape index: {}, may-alias: {0,3}]   ;;  %s793_s1 = inlined_call_operand.vmem [shape: f32[2,3], index: 1, kind: input, shape index: {}]   ;;  %s794_s2 = inlined_call_operand.vmem [shape: f32[2,3], index: 2, kind: input, shape index: {}]   ;;  %s795_s3 = inlined_call_operand.vmem [shape: f32[2,3,1,256], index: 3, kind: output, shape index: {}, may-alias: {0,3}]  }
   0x1   :  { %9 = vsyncpa [#allocation5], 0  ;;  %s679_s12 = smov 0   ;;  %s681_s13 = smov 0  }
   0x2   :  { %s683_s14 = smov 0  }
   0x3 LB: > { %s437_s15 = sadd.s32 4294967295, %s655_s14   ;;  %s27_s16 = sadd.s32 1, %s651_s13  ;;  %s655_s14 = sphi %s683_s14, %s15_s14   ;;  %s651_s13 = sphi %s681_s13, %s809_s13   ;;  %s647_s12 = sphi %s679_s12, %s808_s12  }
   0x4   : > { %p29_p0 = scmp.ge.s32.totalorder %s27_s16, 2  ;;  %p439_p1 = scmp.ge.s32.totalorder %s655_s14, 1 }
   0x5   : > { %p130_p2 = scmp.lt.s32.totalorder %s655_s14, 3  ;;  %p704_p4 = scmp.eq.s32.totalorder %s437_s15, 0 }
   0x6   : > { %s811_s16 = smov (%p29_p0, %s27_s16), 0  ;;  %s143_s21 = sshll.u32 %s793_s1, 4  ;;  %s144_s21 = int_to_ptr.vmem [resolvable:$true] %s143_s21 }
   0x7   : > { %p700_p3 = pnand %p439_p1, %p130_p2  ;;  %s154_s24 = sshll.u32 %s794_s2, 4  ;;  %s155_s24 = int_to_ptr.vmem [resolvable:$true] %s154_s24 }
   0x8   : > { %s800_s18 = scalar_select %p704_p4, 1, 0 }
   0x9   : > { %s799_s17 = scalar_select %p700_p3, 1, 0 }
   0xa   : > { %p546_p5 = pneg %p700_p3  ;;  %s595_s26 = scalar_lea.vmem %s144_s21, 32 }
   0xb   : > { %p596_p7 = scmp.ne.s32.totalorder %s144_s21, %s595_s26  ;;  %p603_p11 = scmp.lt.s32.totalorder %s144_s21, %s144_s21 }
   0xc   : > { %p718_p6 = pnand %p704_p4, %p546_p5  ;;  %p604_p12 = scmp.lt.s32.totalorder %s595_s26, %s595_s26 }
   0xe   : > { %p597_p8 = pneg %p718_p6  ;;  %p605_p13 = por %p604_p12, %p603_p11 }
  0x10   : > { %p598_p9 = pnand %p597_p8, %p596_p7 }
  0x12   : > { %p599_p10 = pneg %p598_p9 }
  0x14   : > { %p606_p0 = pnand %p605_p13, %p599_p10 }
  0x16   : > { %609 = shalt.err (!%p606_p0)
}
  0x17   : > { %s657_s27 = smov [#allocation2]   ;;  %s610_s28 = scalar_lea.vmem %s155_s24, 32 }
  0x18   : > { %549 = dma.vmem_to_smem (!%p718_p6), %s144_s21, 32, %s657_s27, [#allocation3]  }
  0x19   : > { %p611_p1 = scmp.ne.s32.totalorder %s155_s24, %s610_s28  ;;  %p618_p4 = scmp.lt.s32.totalorder %s155_s24, %s155_s24 }
  0x1a   : > { %p619_p3 = scmp.lt.s32.totalorder %s610_s28, %s610_s28 }
  0x1b   : > { %p613_p2 = pnand %p611_p1, %p597_p8 }
  0x1c   : > { %p620_p7 = por %p619_p3, %p618_p4 }
  0x1d   : > { %p614_p5 = pneg %p613_p2 }
  0x1f   : > { %p621_p9 = pnand %p620_p7, %p614_p5 }
  0x21   : > { %624 = shalt.err (!%p621_p9)
}
  0x22   : > { %s658_s29 = smov [#allocation4]   ;;  %p802_p10 = scmp.ne.s32.totalorder %s799_s17, 0 }
  0x23   : > { %552 = dma.vmem_to_smem (!%p718_p6), %s155_s24, 32, %s658_s29, [#allocation5]  }
  0x24   : > { %178 = sbr.rel (%p802_p10) target bundleno = 125 (0x7d), region = 32  ;;  %p803_p11 = scmp.ne.s32.totalorder (!%p802_p10), %s800_s18, 0 }
  0x2b   : > { %638 = dma.done.wait (%p803_p11), [#allocation3], 32  }
  0x2c   : > { %640 = vsyncadd (%p803_p11), [#allocation3], 4294967264 }
  0x2d   : > { %642 = dma.done.wait (%p803_p11), [#allocation5], 32  }
  0x2e   : > { %644 = vsyncadd (%p803_p11), [#allocation5], 4294967264 }
  0x2f   : > { %188 = sfence }
  0x30   : > { %p213_p3 = scmp.lt.s32.totalorder %s647_s12, 1  ;;  %s446_s30 = sshll.u32 %s647_s12, 7 }
  0x31   : > { %s231_s4 = sld [smem:[#allocation2 + %s446_s30]]  ;;  %s239_s6 = sadd.s32 1, %s446_s30 }
  0x32   : > { %s234_s5 = sld [smem:[#allocation4 + %s446_s30]]  ;;  %s813_s12 = smov (!%p213_p3, %s647_s12), 1 }
  0x33   : > { %s248_s7 = sadd.s32 2, %s446_s30  ;;  %s459_s8 = smul.u32 6, %s813_s12 }
  0x34   : > { %s240_s9 = sld [smem:[#allocation2 + %s239_s6]] }
  0x35   : > { %s243_s10 = sld [smem:[#allocation4 + %s239_s6]]  ;;  %s220_s18 = scalar_lea.vmem %s792_s0, %s459_s8 }
  0x36   : > { %s249_s11 = sld [smem:[#allocation2 + %s248_s7]]  ;;  %v229_v0 = vld [vmem:[%s220_s18] sm:$0x3]  ;;  %v447_v4 = vld [vmem:[%s220_s18 + $0x2] sm:$0x3]  ;;  %s228_s22 = scalar_lea.vmem %s795_s3, %s459_s8 }
  0x37   : > { %v232_v1 = vstv %s231_s4  ;;  %s252_s19 = sld [smem:[#allocation4 + %s248_s7]]  ;;  %v448_v5 = vld [vmem:[%s220_s18 + $0x4] sm:$0x3] }
  0x38   : > { %v235_v2 = vstv %s234_s5  ;;  %v233_v3 = vmul.f32 %v232_v1, %v229_v0 }
  0x3a   : > { %v236_v6 = vadd.f32 %v235_v2, %v233_v3  ;;  %v241_v7 = vstv %s240_s9 }
  0x3b   : > { %v242_v8 = vmul.f32 %v447_v4, %v241_v7  ;;  %v244_v9 = vstv %s243_s10 }
  0x3c   : > { %v250_v10 = vstv %s249_s11  ;;  %v255_v12 = vadd.f32 16.0, %v236_v6 }
  0x3d   : > { %v251_v11 = vmul.f32 %v448_v5, %v250_v10  ;;  %v245_v13 = vadd.f32 %v244_v9, %v242_v8  ;;  %v253_v14 = vstv %s252_s19 }
  0x3e   : > { %v256_v16 = vmul.f32 0.00862069, %v255_v12 }
  0x3f   : > { %v254_v15 = vadd.f32 %v253_v14, %v251_v11  ;;  %v257_v17 = vmul.f32 0.002, %v245_v13 }
  0x40   : > { %v269_v19 = vmul.f32 %v256_v16, %v256_v16  ;;  %v450_v20 = vadd.f32 -0.13793103, %v256_v16  ;;  %vm268_vm0 = vcmp.gt.f32.partialorder %v256_v16, 0.2068966 }
  0x41   : > { %v259_v18 = vmul.f32 0.005, %v254_v15  ;;  %v258_v21 = vadd.f32 %v257_v17, %v256_v16 }
  0x42   : > { %v270_v23 = vmul.f32 %v269_v19, %v256_v16  ;;  %v272_v24 = vmul.f32 0.12841916, %v450_v20 }
  0x43   : > { %v260_v22 = vsub.f32 %v256_v16, %v259_v18  ;;  %v263_v25 = vmul.f32 %v258_v21, %v258_v21  ;;  %v449_v26 = vadd.f32 -0.13793103, %v258_v21  ;;  %vm262_vm1 = vcmp.gt.f32.partialorder %v258_v21, 0.2068966 }
  0x44   : > { %v273_v28 = vsel %vm268_vm0, %v270_v23, %v272_v24 }
  0x45   : > { %v261_v27 = vmax.f32 %v260_v22, 0.0  ;;  %v264_v29 = vmul.f32 %v263_v25, %v258_v21  ;;  %v266_v30 = vmul.f32 0.12841916, %v449_v26  ;;  %v281_v33 = vmul.f32 -1.5371516, %v273_v28 }
  0x46   : > { %v286_v34 = vmul.f32 1.87599, %v273_v28  ;;  %v291_v36 = vmul.f32 -0.20404133, %v273_v28  ;;  %v304_v22 = vlaneseq }
  0x47   : > { %v275_v31 = vmul.f32 %v261_v27, %v261_v27  ;;  %v451_v32 = vadd.f32 -0.13793103, %v261_v27  ;;  %v267_v35 = vsel %vm262_vm1, %v264_v29, %v266_v30  ;;  %vm274_vm2 = vcmp.gt.f32.partialorder %v261_v27, 0.2068966 }
  0x48   : > { %v280_v39 = vmul.f32 3.0799804, %v267_v35  ;;  %v285_v40 = vmul.f32 -0.9212478, %v267_v35  ;;  %v290_v41 = vmul.f32 0.05289046, %v267_v35 }
  0x49   : > { %v276_v37 = vmul.f32 %v275_v31, %v261_v27  ;;  %v278_v38 = vmul.f32 0.12841916, %v451_v32 }
  0x4a   : > { %v282_v43 = vadd.f32 %v281_v33, %v280_v39  ;;  %v287_v44 = vadd.f32 %v286_v34, %v285_v40  ;;  %v292_v47 = vadd.f32 %v291_v36, %v290_v41 }
  0x4b   : > { %v279_v42 = vsel %vm274_vm2, %v276_v37, %v278_v38 }
  0x4c   : > { %v283_v45 = vmul.f32 -0.5428213, %v279_v42  ;;  %v288_v46 = vmul.f32 0.04524734, %v279_v42  ;;  %v293_v48 = vmul.f32 1.151232, %v279_v42 }
  0x4e   : > { %v749_v49 = vadd.f32 %v283_v45, %v282_v43  ;;  %v751_v50 = vadd.f32 %v288_v46, %v287_v44  ;;  %v755_v53 = vadd.f32 %v293_v48, %v292_v47 }
  0x50   : > { %v296_v51 = vmax.f32 %v749_v49, 0.0031308  ;;  %v310_v52 = vmax.f32 %v751_v50, 0.0031308  ;;  %v321_v56 = vmax.f32 %v755_v53, 0.0031308 }
  0x51   : > { %vm295_vm14 = vcmp.gt.f32.partialorder %v749_v49, 0.0031308  ;;  %v300_v13 = vmul.f32 12.92, %v749_v49  ;;  %v314_v19 = vmul.f32 12.92, %v751_v50 }
  0x52   : > { %v464_v54 = vand.u32 2147483647, %v296_v51  ;;  %v490_v55 = vand.u32 2147483647, %v310_v52  ;;  %v516_v57 = vand.u32 2147483647, %v321_v56  ;;  %vm481_vm8 = vcmp.ne.f32.partialorder %v296_v51, %v296_v51 }
  0x53   : > { %vm468_vm3 = vcmp.lt.f32.partialorder %v296_v51, 0  ;;  %vm469_vm4 = vcmp.eq.f32.partialorder %v296_v51, 0  ;;  %vm494_vm5 = vcmp.lt.f32.partialorder %v310_v52, 0  ;;  %vm495_vm7 = vcmp.eq.f32.partialorder %v310_v52, 0 }
  0x54   : > { %583 = vlog2.f32 %v464_v54  ;;  %vm758_vm6 = vcmp.eq.f32.partialorder %v464_v54, 2139095040  ;;  %vm762_vm9 = vcmp.eq.f32.partialorder %v490_v55, 2139095040  ;;  %vm470_vm10 = vcmp.eq.f32.partialorder %v296_v51, 1065353216 }
  0x55   : > { %585 = vlog2.f32 %v490_v55  ;;  %vm507_vm11 = vcmp.ne.f32.partialorder %v310_v52, %v310_v52  ;;  %vm496_vm12 = vcmp.eq.f32.partialorder %v310_v52, 1065353216  ;;  %vm520_vm13 = vcmp.lt.f32.partialorder %v321_v56, 0 }
  0x56   : > { %587 = vlog2.f32 %v516_v57  ;;  %vm521_vm15 = vcmp.eq.f32.partialorder %v321_v56, 0  ;;  %vm525_vm0 = vcmp.eq.f32.partialorder %v516_v57, 2139095040  ;;  %vm533_vm1 = vcmp.ne.f32.partialorder %v321_v56, %v321_v56 }
  0x57   : > { %vm522_vm2 = vcmp.eq.f32.partialorder %v321_v56, 1065353216  ;;  %v325_v31 = vmul.f32 12.92, %v755_v53 }
  0x5e   : > { %v584_v58 = vpop.eup %583 }
  0x5f   : > { %v586_v59 = vpop.eup %585  ;;  %v466_v60 = vmul.f32 0.41666666, %v584_v58 }
  0x60   : > { %v492_v61 = vmul.f32 0.41666666, %v586_v59  ;;  %v588_v62 = vpop.eup %587 }
  0x61   : > { %589 = vpow2.f32 %v466_v60  ;;  %v518_v63 = vmul.f32 0.41666666, %v588_v62 }
  0x62   : > { %591 = vpow2.f32 %v492_v61 }
  0x63   : > { %593 = vpow2.f32 %v518_v63 }
  0x6b   : > { %v590_v0 = vpop.eup %589 }
  0x6c   : > { %v592_v2 = vpop.eup %591  ;;  %v474_v3 = vsel %vm468_vm3, 2143289344, %v590_v0  ;;  %vm309_vm3 = vcmp.gt.f32.partialorder %v751_v50, 0.0031308 }
  0x6d   : > { %v475_v5 = vsel %vm469_vm4, 0, %v474_v3  ;;  %v500_v6 = vsel %vm494_vm5, 2143289344, %v592_v2  ;;  %v594_v11 = vpop.eup %593  ;;  %vm306_vm4 = vcmp.lt.s32.totalorder %v304_v22, 256  ;;  %vm320_vm5 = vcmp.gt.f32.partialorder %v755_v53, 0.0031308 }
  0x6e   : > { %v480_v7 = vsel %vm758_vm6, 2139095040, %v475_v5  ;;  %v501_v8 = vsel %vm495_vm7, 0, %v500_v6  ;;  %v526_v17 = vsel %vm520_vm13, 2143289344, %v594_v11 }
  0x6f   : > { %v484_v9 = vsel %vm481_vm8, 2143289344, %v480_v7  ;;  %v506_v10 = vsel %vm762_vm9, 2139095040, %v501_v8  ;;  %v527_v20 = vsel %vm521_vm15, 0, %v526_v17 }
  0x70   : > { %v485_v12 = vsel %vm470_vm10, 1065353216, %v484_v9  ;;  %v510_v14 = vsel %vm507_vm11, 2143289344, %v506_v10  ;;  %v532_v23 = vsel %vm525_vm0, 2139095040, %v527_v20 }
  0x71   : > { %v298_v15 = vmul.f32 1.055, %v485_v12  ;;  %v511_v16 = vsel %vm496_vm12, 1065353216, %v510_v14  ;;  %v536_v25 = vsel %vm533_vm1, 2143289344, %v532_v23 }
  0x72   : > { %v312_v18 = vmul.f32 1.055, %v511_v16  ;;  %v537_v27 = vsel %vm522_vm2, 1065353216, %v536_v25 }
  0x73   : > { %v452_v21 = vadd.f32 -0.055, %v298_v15  ;;  %v323_v30 = vmul.f32 1.055, %v537_v27 }
  0x74   : > { %v453_v24 = vadd.f32 -0.055, %v312_v18 }
  0x75   : > { %v301_v26 = vsel %vm295_vm14, %v452_v21, %v300_v13  ;;  %v455_v34 = vadd.f32 -0.055, %v323_v30 }
  0x76   : > { %v302_v28 = vmax.f32 %v301_v26, 0.0  ;;  %v315_v29 = vsel %vm309_vm3, %v453_v24, %v314_v19 }
  0x77   : > { %v316_v32 = vmax.f32 %v315_v29, 0.0  ;;  %v326_v36 = vsel %vm320_vm5, %v455_v34, %v325_v31 }
  0x78   : > { %v303_v33 = vmin.f32 %v302_v28, 1.0  ;;  %v327_v37 = vmax.f32 %v326_v36, 0.0 }
  0x79   : > { %v317_v35 = vmin.f32 %v316_v32, 1.0 }
  0x7a   : > { %308 = vst.msk [vmem:[%s228_s22] sm:$0x3] %vm306_vm4, %v303_v33  ;;  %v328_v38 = vmin.f32 %v327_v37, 1.0 }
  0x7b   : > { %454 = vst.msk [vmem:[%s228_s22 + $0x2] sm:$0x3] %vm306_vm4, %v317_v35 }
  0x7c   : > { %456 = vst.msk [vmem:[%s228_s22 + $0x4] sm:$0x3] %vm306_vm4, %v328_v38 }
  0x7d PF: > { %s15_s14 = sadd.s32 1, %s655_s14   ;;  %s808_s12 = smov %s651_s13 }
  0x7e   : > { %p12_p4 = scmp.ge.s32.totalorder %s15_s14, 4   ;;  %s809_s13 = smov %s811_s16 }
  0x80   :  { %14 = sbr.rel (!%p12_p4) target bundleno = 3 (0x3), region = 75 }
  0x87   :  { %358 = vsyncpa [#allocation3], 1 }
  0x88   :  { %360 = vsyncpa [#allocation3 + $0x1], 1 }
  0x89   :  { %361 = vsyncpa [#allocation5], 1 }

</bundles_post_ra>
